<compile_context>
chip_gen: v6e
topology: v6e:2x2x1
jax: 0.10.0
libtpu: 0.0.40
codegen_flags: <defaults>
</compile_context>

<pallas_src>
import functools

import jax
import jax.numpy as jnp
import numpy as np
from jax.experimental import pallas as pl
from jax.experimental.pallas import tpu as pltpu

C_IN = 400
C_CONV = 128
KSIZE = 3
STRIDE = 2
PAD = 1
H_FC1, H_FC2 = 64, 32


def _round_up(n, m):
    return ((n + m - 1) // m) * m


def _choose_tp(P):
    # Full MXU-height tiles when the problem is big enough; bf16 sublane tile = 16.
    if P >= 512:
        return 512
    return _round_up(max(P, 1), 16)


def edm_kernel(patches_ref, wc_ref, w1_ref, b1_ref, w2_ref, b2_ref,
               w3_ref, b3_ref, out_ref, acc_ref, *, inv_p):
    t = pl.program_id(1)

    @pl.when(t == 0)
    def _():
        acc_ref[...] = jnp.zeros_like(acc_ref)

    # relu on the input commutes with im2col (zero padding stays zero)
    p = jnp.maximum(patches_ref[0], 0)                                       # (TP, K_pad) bf16
    conv = jnp.dot(p, wc_ref[...], preferred_element_type=jnp.float32)       # (TP, 128) f32
    conv = jnp.maximum(conv, 0.0)
    # partial global-sum for the average pool (zero-padded pixel rows add 0)
    acc_ref[...] += jnp.sum(conv, axis=0, keepdims=True)                     # (1, 128)

    @pl.when(t == pl.num_programs(1) - 1)
    def _():
        gap = acc_ref[...] * inv_p                                           # (1, 128) f32
        h = jnp.dot(gap, w1_ref[...], preferred_element_type=jnp.float32) + b1_ref[...]
        h = jnp.maximum(h, 0.0)
        h = jnp.dot(h, w2_ref[...], preferred_element_type=jnp.float32) + b2_ref[...]
        h = jnp.maximum(h, 0.0)
        out = jnp.dot(h, w3_ref[...], preferred_element_type=jnp.float32) + b3_ref[...]
        out_ref[0] = out                                                     # (1, 128) lane-dense


def _im2col(x_nchw):
    # x: (B, C, H, W) NCHW -> patches (B, P, K) with per-pixel (kh, kw, C) ordering
    B, C, H, W = x_nchw.shape
    x = jnp.transpose(x_nchw, (0, 2, 3, 1))                                  # (B, H, W, C)
    xp = jnp.pad(x, ((0, 0), (PAD, PAD), (PAD, PAD), (0, 0)))
    Ho = (H + 2 * PAD - KSIZE) // STRIDE + 1
    Wo = (W + 2 * PAD - KSIZE) // STRIDE + 1
    cols = []
    for kh in range(KSIZE):
        for kw in range(KSIZE):
            cols.append(xp[:, kh:kh + Ho * STRIDE:STRIDE,
                            kw:kw + Wo * STRIDE:STRIDE, :])                  # (B, Ho, Wo, C)
    patches = jnp.concatenate(cols, axis=-1)                                 # (B, Ho, Wo, 9*C)
    patches = patches.reshape(B, Ho * Wo, KSIZE * KSIZE * C)
    return patches, Ho, Wo


def edm_forward(x, params, *, tile_pixels=None):
    # x: (B, 1, 400, H, W), matching the PyTorch module's input (squeeze(1) -> NCHW)
    x = jnp.squeeze(x, axis=1)
    B = x.shape[0]
    patches, Ho, Wo = _im2col(x)                                             # (B, P, K)
    P = Ho * Wo
    K = patches.shape[-1]

    K_pad = _round_up(K, 128)
    TP = tile_pixels if tile_pixels is not None else _choose_tp(P)
    P_pad = _round_up(P, TP)
    n_pt = P_pad // TP

    patches = jnp.pad(patches, ((0, 0), (0, P_pad - P), (0, K_pad - K)))
    patches = patches.astype(jnp.bfloat16)

    # conv weight flattened in (kh, kw, Cin) order to match the patch layout
    wc = params["conv_w"].transpose(0, 2, 3, 1).reshape(C_CONV, K).T         # (K, 128)
    wc = jnp.pad(wc, ((0, K_pad - K), (0, 0))).astype(jnp.bfloat16)

    w1 = params["w1"].T.astype(jnp.float32)                                  # (128, 64)
    b1 = params["b1"][None, :].astype(jnp.float32)                           # (1, 64)
    w2 = params["w2"].T.astype(jnp.float32)                                  # (64, 32)
    b2 = params["b2"][None, :].astype(jnp.float32)                           # (1, 32)
    w3 = jnp.pad(params["w3"].T, ((0, 0), (0, C_CONV - 1))).astype(jnp.float32)      # (32, 128)
    b3 = jnp.pad(params["b3"][None, :], ((0, 0), (0, C_CONV - 1))).astype(jnp.float32)  # (1, 128)

    kernel = functools.partial(edm_kernel, inv_p=float(1.0 / P))

    out = pl.pallas_call(
        kernel,
        out_shape=jax.ShapeDtypeStruct((B, 1, C_CONV), jnp.float32),
        grid_spec=pltpu.PrefetchScalarGridSpec(
            num_scalar_prefetch=0,
            grid=(B, n_pt),
            in_specs=[
                pl.BlockSpec((1, TP, K_pad), lambda b, t: (b, t, 0)),         # streamed patches
                pl.BlockSpec((K_pad, C_CONV), lambda b, t: (0, 0)),           # resident conv weight
                pl.BlockSpec((C_CONV, H_FC1), lambda b, t: (0, 0)),           # resident MLP params
                pl.BlockSpec((1, H_FC1), lambda b, t: (0, 0)),
                pl.BlockSpec((H_FC1, H_FC2), lambda b, t: (0, 0)),
                pl.BlockSpec((1, H_FC2), lambda b, t: (0, 0)),
                pl.BlockSpec((H_FC2, C_CONV), lambda b, t: (0, 0)),
                pl.BlockSpec((1, C_CONV), lambda b, t: (0, 0)),
            ],
            out_specs=pl.BlockSpec((1, 1, C_CONV), lambda b, t: (b, 0, 0)),
            scratch_shapes=[pltpu.VMEM((1, C_CONV), jnp.float32)],
        ),
        compiler_params=pltpu.CompilerParams(
            dimension_semantics=("parallel", "arbitrary"),
            vmem_limit_bytes=48 * 1024 * 1024,
        ),
    )(patches, wc, w1, b1, w2, b2, w3, b3)

    return out[:, 0, :1]                                                     # (B, 1)


def edm_reference(x, params):
    # pure-JAX f32 reference mirroring the PyTorch forward
    x = jnp.squeeze(x, axis=1)
    x = jnp.maximum(x, 0.0)
    y = jax.lax.conv_general_dilated(
        x, params["conv_w"], window_strides=(STRIDE, STRIDE),
        padding=((PAD, PAD), (PAD, PAD)),
        dimension_numbers=("NCHW", "OIHW", "NCHW"))
    y = jnp.maximum(y, 0.0)
    g = jnp.mean(y, axis=(2, 3))
    h = jnp.maximum(g @ params["w1"].T + params["b1"], 0.0)
    h = jnp.maximum(h @ params["w2"].T + params["b2"], 0.0)
    return h @ params["w3"].T + params["b3"]


def init_params(key):
    ks = jax.random.split(key, 7)
    s = 0.05
    return {
        "conv_w": jax.random.normal(ks[0], (C_CONV, C_IN, KSIZE, KSIZE), jnp.float32) * s,
        "w1": jax.random.normal(ks[1], (H_FC1, C_CONV), jnp.float32) * s,
        "b1": jax.random.normal(ks[2], (H_FC1,), jnp.float32) * s,
        "w2": jax.random.normal(ks[3], (H_FC2, H_FC1), jnp.float32) * s,
        "b2": jax.random.normal(ks[4], (H_FC2,), jnp.float32) * s,
        "w3": jax.random.normal(ks[5], (1, H_FC2), jnp.float32) * s,
        "b3": jax.random.normal(ks[6], (1,), jnp.float32) * s,
    }


if __name__ == "__main__":
    key = jax.random.PRNGKey(0)
    k_x, k_p = jax.random.split(key)
    B, H, W = 2, 8, 8
    x = jax.random.normal(k_x, (B, 1, C_IN, H, W), jnp.float32)
    params = init_params(k_p)

    out = jax.jit(edm_forward)(x, params)
    out = jax.block_until_ready(out)

    ref = jax.block_until_ready(edm_reference(x, params))
    np.testing.assert_allclose(np.asarray(out), np.asarray(ref), rtol=2e-2, atol=2e-2)

    print("KERNEL_OK")
</pallas_src>

<mosaic_0001>
module attributes {stable_mosaic.version = 11 : i64} {
  func.func @edm_kernel(%arg0: i32, %arg1: i32, %arg2: memref<1x16x3712xbf16, #tpu.memory_space<vmem>>, %arg3: memref<3712x128xbf16, #tpu.memory_space<vmem>>, %arg4: memref<128x64xf32, #tpu.memory_space<vmem>>, %arg5: memref<1x64xf32, #tpu.memory_space<vmem>>, %arg6: memref<64x32xf32, #tpu.memory_space<vmem>>, %arg7: memref<1x32xf32, #tpu.memory_space<vmem>>, %arg8: memref<32x128xf32, #tpu.memory_space<vmem>>, %arg9: memref<1x128xf32, #tpu.memory_space<vmem>>, %arg10: memref<1x1x128xf32, #tpu.memory_space<vmem>>, %arg11: memref<1x128xf32, #tpu.memory_space<vmem>>) attributes {dimension_semantics = [#tpu.dimension_semantics<parallel>, #tpu.dimension_semantics<arbitrary>], iteration_bounds = array<i64: 2, 1>, scalar_prefetch = 0 : i64, scratch_operands = 1 : i64, tpu.core_type = #tpu.core_type<tc>, window_params = [{transform_indices = @transform_0, window_bounds = array<i64: 1, 16, 3712>}, {pipeline_mode = #tpu.pipeline_mode<synchronous>, transform_indices = @transform_1, window_bounds = array<i64: 3712, 128>}, {pipeline_mode = #tpu.pipeline_mode<synchronous>, transform_indices = @transform_2, window_bounds = array<i64: 128, 64>}, {pipeline_mode = #tpu.pipeline_mode<synchronous>, transform_indices = @transform_3, window_bounds = array<i64: 1, 64>}, {pipeline_mode = #tpu.pipeline_mode<synchronous>, transform_indices = @transform_4, window_bounds = array<i64: 64, 32>}, {pipeline_mode = #tpu.pipeline_mode<synchronous>, transform_indices = @transform_5, window_bounds = array<i64: 1, 32>}, {pipeline_mode = #tpu.pipeline_mode<synchronous>, transform_indices = @transform_6, window_bounds = array<i64: 32, 128>}, {pipeline_mode = #tpu.pipeline_mode<synchronous>, transform_indices = @transform_7, window_bounds = array<i64: 1, 128>}, {transform_indices = @transform_8, window_bounds = array<i64: 1, 1, 128>}]} {
    %c0_i32 = arith.constant 0 : i32
    %0 = arith.cmpi eq, %arg1, %c0_i32 : i32
    %1 = arith.extui %0 : i1 to i32
    %c0_i32_0 = arith.constant 0 : i32
    %2 = arith.cmpi ne, %1, %c0_i32_0 : i32
    scf.if %2 {
      %cst_14 = arith.constant 0.000000e+00 : f32
      %19 = vector.broadcast %cst_14 : f32 to vector<1x128xf32>
      %c0_15 = arith.constant 0 : index
      %c0_16 = arith.constant 0 : index
      %20 = vector.load %arg11[%c0_15, %c0_16] : memref<1x128xf32, #tpu.memory_space<vmem>>, vector<1x128xf32>
      tpu.vector_store %arg11[%c0_15, %c0_16], %19 {strides = array<i32>} : memref<1x128xf32, #tpu.memory_space<vmem>>, vector<1x128xf32>,
    } else {
    }
    %c0 = arith.constant 0 : index
    %c0_1 = arith.constant 0 : index
    %c0_2 = arith.constant 0 : index
    %3 = vector.load %arg2[%c0, %c0_1, %c0_2] : memref<1x16x3712xbf16, #tpu.memory_space<vmem>>, vector<1x16x3712xbf16>
    %4 = vector.shape_cast %3 : vector<1x16x3712xbf16> to vector<16x3712xbf16>
    %cst = arith.constant 0.000000e+00 : bf16
    %5 = vector.broadcast %cst : bf16 to vector<16x3712xbf16>
    %6 = arith.maximumf %4, %5 : vector<16x3712xbf16>
    %c0_3 = arith.constant 0 : index
    %c0_4 = arith.constant 0 : index
    %7 = vector.load %arg3[%c0_3, %c0_4] : memref<3712x128xbf16, #tpu.memory_space<vmem>>, vector<3712x128xbf16>
    %cst_5 = arith.constant dense<0.000000e+00> : vector<16x128xf32>
    %8 = tpu.matmul %6, %7, %cst_5 {dimension_numbers = #tpu.dot_dimension_numbers<[1], [0], [0], [1], [0, 0, 1, 1], [], []>} : vector<16x3712xbf16>, vector<3712x128xbf16>, vector<16x128xf32> -> vector<16x128xf32>
    %cst_6 = arith.constant 0.000000e+00 : f32
    %9 = vector.broadcast %cst_6 : f32 to vector<16x128xf32>
    %10 = arith.maximumf %8, %9 : vector<16x128xf32>
    %c0_7 = arith.constant 0 : index
    %c0_8 = arith.constant 0 : index
    %11 = vector.load %arg11[%c0_7, %c0_8] : memref<1x128xf32, #tpu.memory_space<vmem>>, vector<1x128xf32>
    %cst_9 = arith.constant dense<0.000000e+00> : vector<128xf32>
    %12 = vector.multi_reduction <add>, %10, %cst_9 [0] : vector<16x128xf32> to vector<128xf32>
    %13 = vector.shape_cast %12 : vector<128xf32> to vector<1x128xf32>
    %14 = arith.addf %11, %13 : vector<1x128xf32>
    %c0_10 = arith.constant 0 : index
    %c0_11 = arith.constant 0 : index
    %15 = vector.load %arg11[%c0_10, %c0_11] : memref<1x128xf32, #tpu.memory_space<vmem>>, vector<1x128xf32>
    tpu.vector_store %arg11[%c0_10, %c0_11], %14 {strides = array<i32>} : memref<1x128xf32, #tpu.memory_space<vmem>>, vector<1x128xf32>,
    %c0_i32_12 = arith.constant 0 : i32
    %16 = arith.cmpi eq, %arg1, %c0_i32_12 : i32
    %17 = arith.extui %16 : i1 to i32
    %c0_i32_13 = arith.constant 0 : i32
    %18 = arith.cmpi ne, %17, %c0_i32_13 : i32
    scf.if %18 {
      %c0_14 = arith.constant 0 : index
      %c0_15 = arith.constant 0 : index
      %19 = vector.load %arg11[%c0_14, %c0_15] : memref<1x128xf32, #tpu.memory_space<vmem>>, vector<1x128xf32>
      %cst_16 = arith.constant 6.250000e-02 : f32
      %20 = vector.broadcast %cst_16 : f32 to vector<1x128xf32>
      %21 = arith.mulf %19, %20 : vector<1x128xf32>
      %c0_17 = arith.constant 0 : index
      %c0_18 = arith.constant 0 : index
      %22 = vector.load %arg4[%c0_17, %c0_18] : memref<128x64xf32, #tpu.memory_space<vmem>>, vector<128x64xf32>
      %cst_19 = arith.constant dense<0.000000e+00> : vector<1x64xf32>
      %23 = tpu.matmul %21, %22, %cst_19 {dimension_numbers = #tpu.dot_dimension_numbers<[1], [0], [0], [1], [0, 0, 1, 1], [], []>} : vector<1x128xf32>, vector<128x64xf32>, vector<1x64xf32> -> vector<1x64xf32>
      %c0_20 = arith.constant 0 : index
      %c0_21 = arith.constant 0 : index
      %24 = vector.load %arg5[%c0_20, %c0_21] : memref<1x64xf32, #tpu.memory_space<vmem>>, vector<1x64xf32>
      %25 = arith.addf %23, %24 : vector<1x64xf32>
      %cst_22 = arith.constant 0.000000e+00 : f32
      %26 = vector.broadcast %cst_22 : f32 to vector<1x64xf32>
      %27 = arith.maximumf %25, %26 : vector<1x64xf32>
      %c0_23 = arith.constant 0 : index
      %c0_24 = arith.constant 0 : index
      %28 = vector.load %arg6[%c0_23, %c0_24] : memref<64x32xf32, #tpu.memory_space<vmem>>, vector<64x32xf32>
      %cst_25 = arith.constant dense<0.000000e+00> : vector<1x32xf32>
      %29 = tpu.matmul %27, %28, %cst_25 {dimension_numbers = #tpu.dot_dimension_numbers<[1], [0], [0], [1], [0, 0, 1, 1], [], []>} : vector<1x64xf32>, vector<64x32xf32>, vector<1x32xf32> -> vector<1x32xf32>
      %c0_26 = arith.constant 0 : index
      %c0_27 = arith.constant 0 : index
      %30 = vector.load %arg7[%c0_26, %c0_27] : memref<1x32xf32, #tpu.memory_space<vmem>>, vector<1x32xf32>
      %31 = arith.addf %29, %30 : vector<1x32xf32>
      %cst_28 = arith.constant 0.000000e+00 : f32
      %32 = vector.broadcast %cst_28 : f32 to vector<1x32xf32>
      %33 = arith.maximumf %31, %32 : vector<1x32xf32>
      %c0_29 = arith.constant 0 : index
      %c0_30 = arith.constant 0 : index
      %34 = vector.load %arg8[%c0_29, %c0_30] : memref<32x128xf32, #tpu.memory_space<vmem>>, vector<32x128xf32>
      %cst_31 = arith.constant dense<0.000000e+00> : vector<1x128xf32>
      %35 = tpu.matmul %33, %34, %cst_31 {dimension_numbers = #tpu.dot_dimension_numbers<[1], [0], [0], [1], [0, 0, 1, 1], [], []>} : vector<1x32xf32>, vector<32x128xf32>, vector<1x128xf32> -> vector<1x128xf32>
      %c0_32 = arith.constant 0 : index
      %c0_33 = arith.constant 0 : index
      %36 = vector.load %arg9[%c0_32, %c0_33] : memref<1x128xf32, #tpu.memory_space<vmem>>, vector<1x128xf32>
      %37 = arith.addf %35, %36 : vector<1x128xf32>
      %c0_34 = arith.constant 0 : index
      %c0_35 = arith.constant 0 : index
      %c0_36 = arith.constant 0 : index
      %38 = vector.load %arg10[%c0_34, %c0_35, %c0_36] : memref<1x1x128xf32, #tpu.memory_space<vmem>>, vector<1x1x128xf32>
      %39 = vector.shape_cast %38 : vector<1x1x128xf32> to vector<1x128xf32>
      %40 = vector.shape_cast %37 : vector<1x128xf32> to vector<1x1x128xf32>
      tpu.vector_store %arg10[%c0_34, %c0_35, %c0_36], %40 {strides = array<i32>} : memref<1x1x128xf32, #tpu.memory_space<vmem>>, vector<1x1x128xf32>,
    } else {
    }
    return
  }
  func.func @transform_0(%arg0: i32, %arg1: i32) -> (i32, i32, i32) {
    %c0_i32 = arith.constant 0 : i32
    %c0_i32_0 = arith.constant 0 : i32
    return %arg0, %arg1, %c0_i32 : i32, i32, i32
  }
  func.func @transform_1(%arg0: i32, %arg1: i32) -> (i32, i32) {
    %c0_i32 = arith.constant 0 : i32
    %c0_i32_0 = arith.constant 0 : i32
    %c0_i32_1 = arith.constant 0 : i32
    return %c0_i32, %c0_i32_0 : i32, i32
  }
  func.func @transform_2(%arg0: i32, %arg1: i32) -> (i32, i32) {
    %c0_i32 = arith.constant 0 : i32
    %c0_i32_0 = arith.constant 0 : i32
    %c0_i32_1 = arith.constant 0 : i32
    return %c0_i32, %c0_i32_0 : i32, i32
  }
  func.func @transform_3(%arg0: i32, %arg1: i32) -> (i32, i32) {
    %c0_i32 = arith.constant 0 : i32
    %c0_i32_0 = arith.constant 0 : i32
    %c0_i32_1 = arith.constant 0 : i32
    return %c0_i32, %c0_i32_0 : i32, i32
  }
  func.func @transform_4(%arg0: i32, %arg1: i32) -> (i32, i32) {
    %c0_i32 = arith.constant 0 : i32
    %c0_i32_0 = arith.constant 0 : i32
    %c0_i32_1 = arith.constant 0 : i32
    return %c0_i32, %c0_i32_0 : i32, i32
  }
  func.func @transform_5(%arg0: i32, %arg1: i32) -> (i32, i32) {
    %c0_i32 = arith.constant 0 : i32
    %c0_i32_0 = arith.constant 0 : i32
    %c0_i32_1 = arith.constant 0 : i32
    return %c0_i32, %c0_i32_0 : i32, i32
  }
  func.func @transform_6(%arg0: i32, %arg1: i32) -> (i32, i32) {
    %c0_i32 = arith.constant 0 : i32
    %c0_i32_0 = arith.constant 0 : i32
    %c0_i32_1 = arith.constant 0 : i32
    return %c0_i32, %c0_i32_0 : i32, i32
  }
  func.func @transform_7(%arg0: i32, %arg1: i32) -> (i32, i32) {
    %c0_i32 = arith.constant 0 : i32
    %c0_i32_0 = arith.constant 0 : i32
    %c0_i32_1 = arith.constant 0 : i32
    return %c0_i32, %c0_i32_0 : i32, i32
  }
  func.func @transform_8(%arg0: i32, %arg1: i32) -> (i32, i32, i32) {
    %c0_i32 = arith.constant 0 : i32
    %c0_i32_0 = arith.constant 0 : i32
    %c0_i32_1 = arith.constant 0 : i32
    return %arg0, %c0_i32, %c0_i32_0 : i32, i32, i32
  }
}

</mosaic_0001>

<bundles_post_ra>
// kernel: edm_forward.1
= control target key start
LH: loop header
LB: loop body
LE: loop exit
PB: predicated region body
PF: predicated region fallthrough
CT: control target
= control target key end

     0   :  { %s4385_s27 = smov 0   ;;  %s4387_s28 = smov 0   ;;  %s5325_s0 = inlined_call_operand.vmem [shape: bf16[2,16,3712], index: 0, kind: input, shape index: {}]   ;;  %s5326_s1 = inlined_call_operand.vmem [shape: bf16[3712,128], index: 1, kind: input, shape index: {}]   ;;  %s5327_s2 = inlined_call_operand.vmem [shape: f32[128,64], index: 2, kind: input, shape index: {}]   ;;  %s5328_s3 = inlined_call_operand.vmem [shape: f32[1,64], index: 3, kind: input, shape index: {}]   ;;  %s5329_s4 = inlined_call_operand.vmem [shape: f32[64,32], index: 4, kind: input, shape index: {}]   ;;  %s5330_s5 = inlined_call_operand.vmem [shape: f32[1,32], index: 5, kind: input, shape index: {}]   ;;  %s5331_s6 = inlined_call_operand.vmem [shape: f32[32,128], index: 6, kind: input, shape index: {}]   ;;  %s5332_s7 = inlined_call_operand.vmem [shape: f32[1,128], index: 7, kind: input, shape index: {}]   ;;  %s5333_s8 = inlined_call_operand.vmem [shape: f32[2,1,128], index: 8, kind: output, shape index: {}]  }
   0x1   :  { %s4389_s29 = smov 0  }
   0x2 LB: > { %s30_s30 = sadd.s32 1, %s4331_s28  ;;  %p3353_p0 = scmp.ge.s32.totalorder %s4335_s29, 1  ;;  %s4335_s29 = sphi %s4389_s29, %s18_s29   ;;  %s4331_s28 = sphi %s4387_s28, %s5335_s28   ;;  %s4327_s27 = sphi %s4385_s27, %s5334_s27  }
   0x3   : > { %p32_p1 = scmp.ge.s32.totalorder %s30_s30, 2  ;;  %p282_p2 = scmp.lt.s32.totalorder %s4335_s29, 3 }
   0x5   : > { %s5337_s30 = smov (%p32_p1, %s30_s30), 0  ;;  %p283_p3 = pnand %p3353_p0, %p282_p2 }
   0x6   : > { %p320_p4 = scmp.lt.s32.totalorder (!%p283_p3), %s4327_s27, 1 }
   0x7   : > { %286 = sbr.rel (%p283_p3) target bundleno = 1087 (0x43f), region = 52 }
   0xc   : > { %v4081_v0 = vld [vmem:[%s5326_s1 + $0x78] sm:$0xff]   ;;  %v4085_v4 = vld [vmem:[%s5326_s1 + $0x70] sm:$0xff]   ;;  %v4089_v8 = vld [vmem:[%s5326_s1 + $0x68] sm:$0xff]   ;;  %s5339_s27 = smov (!%p320_p4, %s4327_s27), 1  ;;  %v4337_v35 = vmov 0   ;;  %vm4339_vm0 = vmmov 0  }
   0xd   : > { %v4082_v1 = vld [vmem:[%s5326_s1 + $0xf8] sm:$0xff]   ;;  %3620 = vmatprep.subr.bf16.mxu0 %v4081_v0  ;;  %v4086_v5 = vld [vmem:[%s5326_s1 + $0xf0] sm:$0xff]   ;;  %v4090_v9 = vld [vmem:[%s5326_s1 + $0xe8] sm:$0xff]   ;;  %s4053_s25 = smul.u32 232, %s5339_s27  ;;  %vm3130_vm1 = vcmask 523264   ;;  %vm3210_vm2 = vcmask 261120   ;;  %s332_s24 = scalar_lea.vmem %s5333_s8, %s5339_s27 }
   0xe   : > { %v4083_v2 = vld [vmem:[%s5326_s1 + $0x38] sm:$0xff]   ;;  %3642 = vmatprep.subr.bf16.mxu1 %v4082_v1  ;;  %v4087_v6 = vld [vmem:[%s5326_s1 + $0x30] sm:$0xff]   ;;  %v4091_v10 = vld [vmem:[%s5326_s1 + $0x28] sm:$0xff]  }
   0xf   : > { %v4084_v3 = vld [vmem:[%s5326_s1 + $0xb8] sm:$0xff]   ;;  %3621 = vmatpush3.bf16.msra.mxu0 %v4083_v2  ;;  %v4088_v7 = vld [vmem:[%s5326_s1 + $0xb0] sm:$0xff]   ;;  %v4092_v11 = vld [vmem:[%s5326_s1 + $0xa8] sm:$0xff]   ;;  %s4503_s18 = scalar_lea.vmem %s5325_s0, %s4053_s25 }
  0x10   : > { %3643 = vmatpush3.bf16.msra.mxu1 %v4084_v3  ;;  %3622 = vmatprep.subr.bf16.mxu0 %v4085_v4  ;;  %v4093_v12 = vld [vmem:[%s5326_s1 + $0x60] sm:$0xff]   ;;  %v4097_v16 = vld [vmem:[%s5326_s1 + $0x58] sm:$0xff]   ;;  %v4101_v20 = vld [vmem:[%s5326_s1 + $0x50] sm:$0xff]  }
  0x11   : > { %3644 = vmatprep.subr.bf16.mxu1 %v4086_v5  ;;  %v4094_v13 = vld [vmem:[%s5326_s1 + $0xe0] sm:$0xff]   ;;  %v4098_v17 = vld [vmem:[%s5326_s1 + $0xd8] sm:$0xff]   ;;  %v4102_v21 = vld [vmem:[%s5326_s1 + $0xd0] sm:$0xff]  }
  0x12   : > { %v4095_v14 = vld [vmem:[%s5326_s1 + $0x20] sm:$0xff]   ;;  %v4099_v18 = vld [vmem:[%s5326_s1 + $0x18] sm:$0xff]   ;;  %v4103_v22 = vld [vmem:[%s5326_s1 + $0x10] sm:$0xff]  }
  0x13   : > { %3623 = vmatpush3.bf16.msra.mxu0 %v4087_v6  ;;  %v4096_v15 = vld [vmem:[%s5326_s1 + $0xa0] sm:$0xff]   ;;  %v4100_v19 = vld [vmem:[%s5326_s1 + $0x98] sm:$0xff]   ;;  %v4104_v23 = vld [vmem:[%s5326_s1 + $0x90] sm:$0xff]  }
  0x14   : > { %3645 = vmatpush3.bf16.msra.mxu1 %v4088_v7  ;;  %3624 = vmatprep.subr.bf16.mxu0 %v4089_v8  ;;  %v4105_v24 = vld [vmem:[%s5326_s1 + $0x48] sm:$0xff]   ;;  %v4109_v28 = vld [vmem:[%s5326_s1 + $0x40] sm:$0xff]   ;;  %v354_v33 = vld [vmem:[%s4503_s18 + $0x74] sm:$0xff] }
  0x15   : > { %3646 = vmatprep.subr.bf16.mxu1 %v4090_v9  ;;  %v4106_v25 = vld [vmem:[%s5326_s1 + $0xc8] sm:$0xff]   ;;  %v4110_v29 = vld [vmem:[%s5326_s1 + $0xc0] sm:$0xff]   ;;  %v384_v37 = vmax.bf16 %v4337_v35, %v354_v33  ;;  %v4113_v41 = vld [vmem:[%s5326_s1 + $0x178] sm:$0xff]  }
  0x16   : > { %v4107_v26 = vld [vmem:[%s5326_s1 + $0x8] sm:$0xff]   ;;  %v4111_v30 = vld [vmem:[%s5326_s1] sm:$0xff]   ;;  %v4114_v44 = vld [vmem:[%s5326_s1 + $0x138] sm:$0xff]  }
  0x17   : > { %3625 = vmatpush3.bf16.msra.mxu0 %v4091_v10  ;;  %v4108_v27 = vld [vmem:[%s5326_s1 + $0x88] sm:$0xff]   ;;  %v4112_v31 = vld [vmem:[%s5326_s1 + $0x80] sm:$0xff]   ;;  %v4115_v47 = vld [vmem:[%s5326_s1 + $0x1f8] sm:$0xff]  }
  0x18   : > { %3647 = vmatpush3.bf16.msra.mxu1 %v4092_v11  ;;  %3626 = vmatprep.subr.bf16.mxu0 %v4093_v12  ;;  %v339_v32 = vld [vmem:[%s4503_s18] sm:$0xff]  ;;  %v340_v34 = vld [vmem:[%s4503_s18 + $0x8] sm:$0xff]  ;;  %v4116_v48 = vld [vmem:[%s5326_s1 + $0x1b8] sm:$0xff]  }
  0x19   : > { %3648 = vmatprep.subr.bf16.mxu1 %v4094_v13  ;;  %v369_v36 = vmax.bf16 %v4337_v35, %v339_v32  ;;  %v355_v38 = vld [vmem:[%s4503_s18 + $0x7c] sm:$0xff]  ;;  %v370_v39 = vmax.bf16 %v4337_v35, %v340_v34  ;;  %v4117_v49 = vld [vmem:[%s5326_s1 + $0x170] sm:$0xff]   ;;  %v4121_v53 = vld [vmem:[%s5326_s1 + $0x168] sm:$0xff]  }
  0x1a   : > { %v385_v40 = vmax.bf16 %v4337_v35, %v355_v38  ;;  %v4118_v50 = vld [vmem:[%s5326_s1 + $0x130] sm:$0xff]   ;;  %v4122_v54 = vld [vmem:[%s5326_s1 + $0x128] sm:$0xff]   ;;  %v4125_v57 = vld [vmem:[%s5326_s1 + $0x160] sm:$0xff]  }
  0x1b   : > { %3627 = vmatpush3.bf16.msra.mxu0 %v4095_v14  ;;  %v3356_v42 = vcombine.high %v369_v36, %v384_v37  ;;  %v3355_v43 = vcombine.low %v369_v36, %v384_v37  ;;  %v4119_v51 = vld [vmem:[%s5326_s1 + $0x1f0] sm:$0xff]   ;;  %v4123_v55 = vld [vmem:[%s5326_s1 + $0x1e8] sm:$0xff]   ;;  %v4126_v58 = vld [vmem:[%s5326_s1 + $0x120] sm:$0xff]  }
  0x1c   : > { %3649 = vmatpush3.bf16.msra.mxu1 %v4096_v15  ;;  %3628 = vmatprep.subr.bf16.mxu0 %v4097_v16  ;;  %v3358_v45 = vcombine.high %v370_v39, %v385_v40  ;;  %v3357_v46 = vcombine.low %v370_v39, %v385_v40  ;;  %v4120_v52 = vld [vmem:[%s5326_s1 + $0x1b0] sm:$0xff]   ;;  %v4124_v56 = vld [vmem:[%s5326_s1 + $0x1a8] sm:$0xff]   ;;  %v4127_v59 = vld [vmem:[%s5326_s1 + $0x1e0] sm:$0xff]  }
  0x1d   : > { %3650 = vmatprep.subr.bf16.mxu1 %v4098_v17  ;;  %2433 = vmatprep.mubr.bf16.mxu0 %v3356_v42  ;;  %v4128_v60 = vld [vmem:[%s5326_s1 + $0x1a0] sm:$0xff]   ;;  %v4129_v61 = vld [vmem:[%s5326_s1 + $0x158] sm:$0xff]   ;;  %v4133_v1 = vld [vmem:[%s5326_s1 + $0x150] sm:$0xff]  }
  0x1e   : > { %2474 = vmatprep.mubr.bf16.mxu1 %v3358_v45  ;;  %v4130_v62 = vld [vmem:[%s5326_s1 + $0x118] sm:$0xff]   ;;  %v4134_v2 = vld [vmem:[%s5326_s1 + $0x110] sm:$0xff]   ;;  %v4137_v5 = vld [vmem:[%s5326_s1 + $0x148] sm:$0xff]  }
  0x1f   : > { %3629 = vmatpush3.bf16.msra.mxu0 %v4099_v18  ;;  %v4131_v63 = vld [vmem:[%s5326_s1 + $0x1d8] sm:$0xff]   ;;  %v4135_v3 = vld [vmem:[%s5326_s1 + $0x1d0] sm:$0xff]   ;;  %v4138_v6 = vld [vmem:[%s5326_s1 + $0x108] sm:$0xff]  }
  0x20   : > { %3651 = vmatpush3.bf16.msra.mxu1 %v4100_v19  ;;  %3630 = vmatprep.subr.bf16.mxu0 %v4101_v20  ;;  %v4132_v0 = vld [vmem:[%s5326_s1 + $0x198] sm:$0xff]   ;;  %v4136_v4 = vld [vmem:[%s5326_s1 + $0x190] sm:$0xff]   ;;  %v4139_v7 = vld [vmem:[%s5326_s1 + $0x1c8] sm:$0xff]  }
  0x21   : > { %3652 = vmatprep.subr.bf16.mxu1 %v4102_v21  ;;  %v4140_v8 = vld [vmem:[%s5326_s1 + $0x188] sm:$0xff]   ;;  %v4141_v9 = vld [vmem:[%s5326_s1 + $0x140] sm:$0xff]   ;;  %v341_v12 = vld [vmem:[%s4503_s18 + $0x10] sm:$0xff] }
  0x22   : > { %v4142_v10 = vld [vmem:[%s5326_s1 + $0x100] sm:$0xff]   ;;  %v371_v14 = vmax.bf16 %v4337_v35, %v341_v12  ;;  %v4145_v17 = vld [vmem:[%s5326_s1 + $0x278] sm:$0xff]   ;;  %v357_v21 = vld [vmem:[%s4503_s18 + $0x8c] sm:$0xff] }
  0x23   : > { %3631 = vmatpush3.bf16.msra.mxu0 %v4103_v22  ;;  %v4143_v11 = vld [vmem:[%s5326_s1 + $0x1c0] sm:$0xff]   ;;  %v342_v20 = vld [vmem:[%s4503_s18 + $0x18] sm:$0xff]  ;;  %v4152_v32 = vld [vmem:[%s5326_s1 + $0x2b0] sm:$0xff]  }
  0x24   : > { %3653 = vmatpush3.bf16.msra.mxu1 %v4104_v23  ;;  %3632 = vmatprep.subr.bf16.mxu0 %v4105_v24  ;;  %v356_v13 = vld [vmem:[%s4503_s18 + $0x84] sm:$0xff]  ;;  %v372_v22 = vmax.bf16 %v4337_v35, %v342_v20  ;;  %v387_v23 = vmax.bf16 %v4337_v35, %v357_v21  ;;  %v4146_v24 = vld [vmem:[%s5326_s1 + $0x238] sm:$0xff]   ;;  %v4183_v12 = vld [vmem:[%s5326_s1 + $0x3f0] sm:$0xff]  }
  0x25   : > { %3654 = vmatprep.subr.bf16.mxu1 %v4106_v25  ;;  %v386_v15 = vmax.bf16 %v4337_v35, %v356_v13  ;;  %v4144_v16 = vld [vmem:[%s5326_s1 + $0x180] sm:$0xff]   ;;  %v4147_v25 = vld [vmem:[%s5326_s1 + $0x2f8] sm:$0xff]   ;;  %v4153_v33 = vld [vmem:[%s5326_s1 + $0x268] sm:$0xff]  }
  0x26   : > { %v4154_v34 = vld [vmem:[%s5326_s1 + $0x228] sm:$0xff]   ;;  %v4157_v38 = vld [vmem:[%s5326_s1 + $0x260] sm:$0xff]   ;;  %v4161_v42 = vld [vmem:[%s5326_s1 + $0x258] sm:$0xff]  }
  0x27   : > { %3633 = vmatpush3.bf16.msra.mxu0 %v4107_v26  ;;  %v3360_v18 = vcombine.high %v371_v14, %v386_v15  ;;  %v3359_v19 = vcombine.low %v371_v14, %v386_v15  ;;  %v3362_v26 = vcombine.high %v372_v22, %v387_v23  ;;  %v4155_v36 = vld [vmem:[%s5326_s1 + $0x2e8] sm:$0xff]   ;;  %v4158_v39 = vld [vmem:[%s5326_s1 + $0x220] sm:$0xff]   ;;  %v4164_v45 = vld [vmem:[%s5326_s1 + $0x298] sm:$0xff]  }
  0x28   : > { %3655 = vmatpush3.bf16.msra.mxu1 %v4108_v27  ;;  %3634 = vmatprep.subr.bf16.mxu0 %v4109_v28  ;;  %v3361_v27 = vcombine.low %v372_v22, %v387_v23  ;;  %v4148_v28 = vld [vmem:[%s5326_s1 + $0x2b8] sm:$0xff]   ;;  %v4156_v37 = vld [vmem:[%s5326_s1 + $0x2a8] sm:$0xff]   ;;  %v4159_v40 = vld [vmem:[%s5326_s1 + $0x2e0] sm:$0xff]  }
  0x29   : > { %3656 = vmatprep.subr.bf16.mxu1 %v4110_v29  ;;  %v4149_v29 = vld [vmem:[%s5326_s1 + $0x270] sm:$0xff]   ;;  %v4185_v14 = vld [vmem:[%s5326_s1 + $0x368] sm:$0xff]   ;;  %v4190_v20 = vld [vmem:[%s5326_s1 + $0x320] sm:$0xff]  }
  0x2a   : > { %v4184_v13 = vld [vmem:[%s5326_s1 + $0x3b0] sm:$0xff]   ;;  %v4186_v15 = vld [vmem:[%s5326_s1 + $0x328] sm:$0xff]   ;;  %v4191_v21 = vld [vmem:[%s5326_s1 + $0x3e0] sm:$0xff]  }
  0x2b   : > { %3635 = vmatpush3.bf16.msra.mxu0 %v4111_v30  ;;  %v4150_v30 = vld [vmem:[%s5326_s1 + $0x230] sm:$0xff]   ;;  %v4192_v22 = vld [vmem:[%s5326_s1 + $0x3a0] sm:$0xff]   ;;  %v4193_v23 = vld [vmem:[%s5326_s1 + $0x358] sm:$0xff]  }
  0x2c   : > { %3657 = vmatpush3.bf16.msra.mxu1 %v4112_v31  ;;  %3664 = vmatprep.subr.bf16.mxu0 %v4113_v41  ;;  %v4151_v31 = vld [vmem:[%s5326_s1 + $0x2f0] sm:$0xff]   ;;  %v4160_v41 = vld [vmem:[%s5326_s1 + $0x2a0] sm:$0xff]  }
  0x2d   : > { %3686 = vmatprep.subr.bf16.mxu1 %v4115_v47  ;;  %v4166_v47 = vld [vmem:[%s5326_s1 + $0x210] sm:$0xff]  }
  0x2e   : > { %2434 = vmatmul.mubr.bf16.vlgmr.msra.gmra.mxu0 %v3355_v43  ;;  %v4162_v43 = vld [vmem:[%s5326_s1 + $0x218] sm:$0xff]  }
  0x2f   : > { %2475 = vmatmul.mubr.bf16.vlgmr.msra.gmra.mxu1 %v3357_v46  ;;  %3665 = vmatpush3.bf16.msra.mxu0 %v4114_v44  ;;  %v4163_v44 = vld [vmem:[%s5326_s1 + $0x2d8] sm:$0xff]   ;;  %v4165_v46 = vld [vmem:[%s5326_s1 + $0x250] sm:$0xff]  }
  0x30   : > { %3666 = vmatprep.subr.bf16.mxu0 %v4117_v49  ;;  %3687 = vmatpush3.bf16.msra.mxu1 %v4116_v48  ;;  %v4167_v48 = vld [vmem:[%s5326_s1 + $0x2d0] sm:$0xff]  }
  0x31   : > { %3688 = vmatprep.subr.bf16.mxu1 %v4119_v51  ;;  %2515 = vmatprep.mubr.bf16.mxu0 %v3360_v18  ;;  %v4168_v49 = vld [vmem:[%s5326_s1 + $0x290] sm:$0xff]   ;;  %v4170_v51 = vld [vmem:[%s5326_s1 + $0x208] sm:$0xff]  }
  0x32   : > { %2556 = vmatprep.mubr.bf16.mxu1 %v3362_v26  ;;  %v4188_v18 = vld [vmem:[%s5326_s1 + $0x3a8] sm:$0xff]   ;;  %v4196_v26 = vld [vmem:[%s5326_s1 + $0x398] sm:$0xff]  }
  0x33   : > { %3667 = vmatpush3.bf16.msra.mxu0 %v4118_v50  ;;  %v4169_v50 = vld [vmem:[%s5326_s1 + $0x248] sm:$0xff]  }
  0x34   : > { %3668 = vmatprep.subr.bf16.mxu0 %v4121_v53  ;;  %3689 = vmatpush3.bf16.msra.mxu1 %v4120_v52  ;;  %v4171_v52 = vld [vmem:[%s5326_s1 + $0x2c8] sm:$0xff]  }
  0x35   : > { %3690 = vmatprep.subr.bf16.mxu1 %v4123_v55  ;;  %v4172_v53 = vld [vmem:[%s5326_s1 + $0x288] sm:$0xff]   ;;  %v4174_v55 = vld [vmem:[%s5326_s1 + $0x200] sm:$0xff]  }
  0x37   : > { %3669 = vmatpush3.bf16.msra.mxu0 %v4122_v54  ;;  %v4173_v54 = vld [vmem:[%s5326_s1 + $0x240] sm:$0xff]  }
  0x38   : > { %3670 = vmatprep.subr.bf16.mxu0 %v4125_v57  ;;  %3691 = vmatpush3.bf16.msra.mxu1 %v4124_v56  ;;  %v4175_v56 = vld [vmem:[%s5326_s1 + $0x2c0] sm:$0xff]  }
  0x39   : > { %3692 = vmatprep.subr.bf16.mxu1 %v4127_v59  ;;  %v343_v57 = vld [vmem:[%s4503_s18 + $0x20] sm:$0xff] }
  0x3a   : > { %v373_v59 = vmax.bf16 %v4337_v35, %v343_v57  ;;  %v4214_v57 = vld [vmem:[%s5326_s1 + $0x430] sm:$0xff]  }
  0x3b   : > { %3671 = vmatpush3.bf16.msra.mxu0 %v4126_v58  ;;  %v358_v58 = vld [vmem:[%s4503_s18 + $0x94] sm:$0xff] }
  0x3c   : > { %3672 = vmatprep.subr.bf16.mxu0 %v4129_v61  ;;  %3693 = vmatpush3.bf16.msra.mxu1 %v4128_v60  ;;  %v388_v60 = vmax.bf16 %v4337_v35, %v358_v58  ;;  %v4176_v61 = vld [vmem:[%s5326_s1 + $0x280] sm:$0xff]   ;;  %v4215_v58 = vld [vmem:[%s5326_s1 + $0x4f0] sm:$0xff]  }
  0x3d   : > { %3694 = vmatprep.subr.bf16.mxu1 %v4131_v63  ;;  %v344_v63 = vld [vmem:[%s4503_s18 + $0x28] sm:$0xff] }
  0x3f   : > { %3673 = vmatpush3.bf16.msra.mxu0 %v4130_v62  ;;  %v4177_v62 = vld [vmem:[%s5326_s1 + $0x378] sm:$0xff]  }
  0x40   : > { %3674 = vmatprep.subr.bf16.mxu0 %v4133_v1  ;;  %3695 = vmatpush3.bf16.msra.mxu1 %v4132_v0  ;;  %v359_v0 = vld [vmem:[%s4503_s18 + $0x9c] sm:$0xff]  ;;  %v3364_v1 = vcombine.high %v373_v59, %v388_v60 }
  0x41   : > { %3696 = vmatprep.subr.bf16.mxu1 %v4135_v3  ;;  %v374_v3 = vmax.bf16 %v4337_v35, %v344_v63  ;;  %v4220_v63 = vld [vmem:[%s5326_s1 + $0x4a8] sm:$0xff]  }
  0x43   : > { %3675 = vmatpush3.bf16.msra.mxu0 %v4134_v2  ;;  %v3363_v2 = vcombine.low %v373_v59, %v388_v60  ;;  %v4216_v59 = vld [vmem:[%s5326_s1 + $0x4b0] sm:$0xff]   ;;  %v4217_v60 = vld [vmem:[%s5326_s1 + $0x468] sm:$0xff]  }
  0x44   : > { %3676 = vmatprep.subr.bf16.mxu0 %v4137_v5  ;;  %3697 = vmatpush3.bf16.msra.mxu1 %v4136_v4  ;;  %v389_v4 = vmax.bf16 %v4337_v35, %v359_v0  ;;  %v4178_v5 = vld [vmem:[%s5326_s1 + $0x338] sm:$0xff]   ;;  %v4221_v0 = vld [vmem:[%s5326_s1 + $0x460] sm:$0xff]  }
  0x45   : > { %3698 = vmatprep.subr.bf16.mxu1 %v4139_v7 }
  0x46   : > { %v3366_v7 = vcombine.high %v374_v3, %v389_v4 }
  0x47   : > { %3677 = vmatpush3.bf16.msra.mxu0 %v4138_v6  ;;  %v4179_v6 = vld [vmem:[%s5326_s1 + $0x3f8] sm:$0xff]  }
  0x48   : > { %3678 = vmatprep.subr.bf16.mxu0 %v4141_v9  ;;  %3699 = vmatpush3.bf16.msra.mxu1 %v4140_v8  ;;  %v3365_v8 = vcombine.low %v374_v3, %v389_v4  ;;  %v4180_v9 = vld [vmem:[%s5326_s1 + $0x3b8] sm:$0xff]   ;;  %v4224_v3 = vld [vmem:[%s5326_s1 + $0x4a0] sm:$0xff]  }
  0x49   : > { %3700 = vmatprep.subr.bf16.mxu1 %v4143_v11  ;;  %v4182_v11 = vld [vmem:[%s5326_s1 + $0x330] sm:$0xff]   ;;  %v4225_v4 = vld [vmem:[%s5326_s1 + $0x458] sm:$0xff]  }
  0x4b   : > { %3679 = vmatpush3.bf16.msra.mxu0 %v4142_v10  ;;  %v4181_v10 = vld [vmem:[%s5326_s1 + $0x370] sm:$0xff]  }
  0x4c   : > { %3708 = vmatprep.subr.bf16.mxu0 %v4145_v17  ;;  %3701 = vmatpush3.bf16.msra.mxu1 %v4144_v16  ;;  %v4338_v16 = vmov 0.0   ;;  %v4187_v17 = vld [vmem:[%s5326_s1 + $0x3e8] sm:$0xff]  }
  0x4d   : > { %3730 = vmatprep.subr.bf16.mxu1 %v4147_v25  ;;  %338 = vst [vmem:[#allocation2] sm:$0x1] %v4338_v16  ;;  %v4195_v25 = vld [vmem:[%s5326_s1 + $0x3d8] sm:$0xff]  }
  0x4e   : > { %2516 = vmatmul.mubr.bf16.vlgmr.msra.gmra.mxu0 %v3359_v19  ;;  %v4189_v19 = vld [vmem:[%s5326_s1 + $0x360] sm:$0xff]  }
  0x4f   : > { %3709 = vmatpush3.bf16.msra.mxu0 %v4146_v24  ;;  %2557 = vmatmul.mubr.bf16.vlgmr.msra.gmra.mxu1 %v3361_v27  ;;  %v4194_v24 = vld [vmem:[%s5326_s1 + $0x318] sm:$0xff]   ;;  %v4197_v27 = vld [vmem:[%s5326_s1 + $0x350] sm:$0xff]  }
  0x50   : > { %3710 = vmatprep.subr.bf16.mxu0 %v4149_v29  ;;  %3731 = vmatpush3.bf16.msra.mxu1 %v4148_v28  ;;  %v4198_v28 = vld [vmem:[%s5326_s1 + $0x310] sm:$0xff]  }
  0x51   : > { %3732 = vmatprep.subr.bf16.mxu1 %v4151_v31  ;;  %2597 = vmatprep.mubr.bf16.mxu0 %v3364_v1  ;;  %v4199_v29 = vld [vmem:[%s5326_s1 + $0x3d0] sm:$0xff]   ;;  %v4201_v31 = vld [vmem:[%s5326_s1 + $0x348] sm:$0xff]   ;;  %v4222_v1 = vld [vmem:[%s5326_s1 + $0x420] sm:$0xff]  }
  0x52   : > { %2638 = vmatprep.mubr.bf16.mxu1 %v3366_v7  ;;  %v4228_v7 = vld [vmem:[%s5326_s1 + $0x498] sm:$0xff]  }
  0x53   : > { %3711 = vmatpush3.bf16.msra.mxu0 %v4150_v30  ;;  %v4200_v30 = vld [vmem:[%s5326_s1 + $0x390] sm:$0xff]  }
  0x54   : > { %3712 = vmatprep.subr.bf16.mxu0 %v4153_v33  ;;  %3733 = vmatpush3.bf16.msra.mxu1 %v4152_v32  ;;  %v4202_v32 = vld [vmem:[%s5326_s1 + $0x308] sm:$0xff]  }
  0x55   : > { %3734 = vmatprep.subr.bf16.mxu1 %v4155_v36  ;;  %v4203_v33 = vld [vmem:[%s5326_s1 + $0x3c8] sm:$0xff]   ;;  %v4205_v36 = vld [vmem:[%s5326_s1 + $0x340] sm:$0xff]  }
  0x57   : > { %3713 = vmatpush3.bf16.msra.mxu0 %v4154_v34  ;;  %v4204_v34 = vld [vmem:[%s5326_s1 + $0x388] sm:$0xff]  }
  0x58   : > { %3714 = vmatprep.subr.bf16.mxu0 %v4157_v38  ;;  %3735 = vmatpush3.bf16.msra.mxu1 %v4156_v37  ;;  %v4206_v37 = vld [vmem:[%s5326_s1 + $0x300] sm:$0xff]  }
  0x59   : > { %3736 = vmatprep.subr.bf16.mxu1 %v4159_v40  ;;  %v4207_v38 = vld [vmem:[%s5326_s1 + $0x3c0] sm:$0xff]  }
  0x5a   : > { %v360_v40 = vld [vmem:[%s4503_s18 + $0xa4] sm:$0xff] }
  0x5b   : > { %3715 = vmatpush3.bf16.msra.mxu0 %v4158_v39  ;;  %v345_v39 = vld [vmem:[%s4503_s18 + $0x30] sm:$0xff] }
  0x5c   : > { %3716 = vmatprep.subr.bf16.mxu0 %v4161_v42  ;;  %3737 = vmatpush3.bf16.msra.mxu1 %v4160_v41  ;;  %v375_v41 = vmax.bf16 %v4337_v35, %v345_v39  ;;  %v390_v42 = vmax.bf16 %v4337_v35, %v360_v40  ;;  %v4246_v39 = vld [vmem:[%s5326_s1 + $0x530] sm:$0xff]  }
  0x5d   : > { %3738 = vmatprep.subr.bf16.mxu1 %v4163_v44  ;;  %v4209_v44 = vld [vmem:[%s5326_s1 + $0x478] sm:$0xff]   ;;  %v4247_v40 = vld [vmem:[%s5326_s1 + $0x5f0] sm:$0xff]  }
  0x5f   : > { %3717 = vmatpush3.bf16.msra.mxu0 %v4162_v43  ;;  %v4208_v43 = vld [vmem:[%s5326_s1 + $0x380] sm:$0xff]  }
  0x60   : > { %3718 = vmatprep.subr.bf16.mxu0 %v4165_v46  ;;  %3739 = vmatpush3.bf16.msra.mxu1 %v4164_v45  ;;  %v346_v45 = vld [vmem:[%s4503_s18 + $0x38] sm:$0xff]  ;;  %v3368_v46 = vcombine.high %v375_v41, %v390_v42 }
  0x61   : > { %3740 = vmatprep.subr.bf16.mxu1 %v4167_v48  ;;  %v361_v48 = vld [vmem:[%s4503_s18 + $0xac] sm:$0xff] }
  0x63   : > { %3719 = vmatpush3.bf16.msra.mxu0 %v4166_v47  ;;  %v3367_v47 = vcombine.low %v375_v41, %v390_v42  ;;  %v4248_v41 = vld [vmem:[%s5326_s1 + $0x5b0] sm:$0xff]   ;;  %v4249_v42 = vld [vmem:[%s5326_s1 + $0x568] sm:$0xff]  }
  0x64   : > { %3720 = vmatprep.subr.bf16.mxu0 %v4169_v50  ;;  %3741 = vmatpush3.bf16.msra.mxu1 %v4168_v49  ;;  %v376_v49 = vmax.bf16 %v4337_v35, %v346_v45  ;;  %v391_v50 = vmax.bf16 %v4337_v35, %v361_v48  ;;  %v4252_v45 = vld [vmem:[%s5326_s1 + $0x5a8] sm:$0xff]   ;;  %v4255_v48 = vld [vmem:[%s5326_s1 + $0x5e0] sm:$0xff]  }
  0x65   : > { %3742 = vmatprep.subr.bf16.mxu1 %v4171_v52  ;;  %v4211_v52 = vld [vmem:[%s5326_s1 + $0x4f8] sm:$0xff]  }
  0x67   : > { %3721 = vmatpush3.bf16.msra.mxu0 %v4170_v51  ;;  %v4210_v51 = vld [vmem:[%s5326_s1 + $0x438] sm:$0xff]  }
  0x68   : > { %3722 = vmatprep.subr.bf16.mxu0 %v4173_v54  ;;  %3743 = vmatpush3.bf16.msra.mxu1 %v4172_v53  ;;  %v3370_v53 = vcombine.high %v376_v49, %v391_v50  ;;  %v3369_v54 = vcombine.low %v376_v49, %v391_v50  ;;  %v4256_v49 = vld [vmem:[%s5326_s1 + $0x5a0] sm:$0xff]   ;;  %v4257_v50 = vld [vmem:[%s5326_s1 + $0x558] sm:$0xff]  }
  0x69   : > { %3744 = vmatprep.subr.bf16.mxu1 %v4175_v56  ;;  %v4213_v56 = vld [vmem:[%s5326_s1 + $0x470] sm:$0xff]  }
  0x6b   : > { %3723 = vmatpush3.bf16.msra.mxu0 %v4174_v55  ;;  %v4212_v55 = vld [vmem:[%s5326_s1 + $0x4b8] sm:$0xff]  }
  0x6c   : > { %3745 = vmatpush3.bf16.msra.mxu1 %v4176_v61  ;;  %3752 = vmatprep.subr.bf16.mxu0 %v4177_v62  ;;  %v4218_v61 = vld [vmem:[%s5326_s1 + $0x428] sm:$0xff]  }
  0x6d   : > { %3774 = vmatprep.subr.bf16.mxu1 %v4179_v6  ;;  %v4219_v62 = vld [vmem:[%s5326_s1 + $0x4e8] sm:$0xff]   ;;  %v4227_v6 = vld [vmem:[%s5326_s1 + $0x4d8] sm:$0xff]  }
  0x6e   : > { %2598 = vmatmul.mubr.bf16.vlgmr.msra.gmra.mxu0 %v3363_v2  ;;  %v4223_v2 = vld [vmem:[%s5326_s1 + $0x4e0] sm:$0xff]  }
  0x6f   : > { %3753 = vmatpush3.bf16.msra.mxu0 %v4178_v5  ;;  %2639 = vmatmul.mubr.bf16.vlgmr.msra.gmra.mxu1 %v3365_v8  ;;  %v4226_v5 = vld [vmem:[%s5326_s1 + $0x418] sm:$0xff]   ;;  %v4229_v8 = vld [vmem:[%s5326_s1 + $0x450] sm:$0xff]  }
  0x70   : > { %3754 = vmatprep.subr.bf16.mxu0 %v4181_v10  ;;  %3775 = vmatpush3.bf16.msra.mxu1 %v4180_v9  ;;  %v4230_v9 = vld [vmem:[%s5326_s1 + $0x410] sm:$0xff]  }
  0x71   : > { %3776 = vmatprep.subr.bf16.mxu1 %v4183_v12  ;;  %2679 = vmatprep.mubr.bf16.mxu0 %v3368_v46  ;;  %v4231_v10 = vld [vmem:[%s5326_s1 + $0x4d0] sm:$0xff]   ;;  %v4233_v12 = vld [vmem:[%s5326_s1 + $0x448] sm:$0xff]   ;;  %v4253_v46 = vld [vmem:[%s5326_s1 + $0x560] sm:$0xff]  }
  0x72   : > { %2720 = vmatprep.mubr.bf16.mxu1 %v3370_v53  ;;  %v4260_v53 = vld [vmem:[%s5326_s1 + $0x598] sm:$0xff]  }
  0x73   : > { %3755 = vmatpush3.bf16.msra.mxu0 %v4182_v11  ;;  %v4232_v11 = vld [vmem:[%s5326_s1 + $0x490] sm:$0xff]  }
  0x74   : > { %3756 = vmatprep.subr.bf16.mxu0 %v4185_v14  ;;  %3777 = vmatpush3.bf16.msra.mxu1 %v4184_v13  ;;  %v4234_v13 = vld [vmem:[%s5326_s1 + $0x408] sm:$0xff]  }
  0x75   : > { %3778 = vmatprep.subr.bf16.mxu1 %v4187_v17  ;;  %v4235_v14 = vld [vmem:[%s5326_s1 + $0x4c8] sm:$0xff]   ;;  %v4237_v17 = vld [vmem:[%s5326_s1 + $0x440] sm:$0xff]  }
  0x77   : > { %3757 = vmatpush3.bf16.msra.mxu0 %v4186_v15  ;;  %v4236_v15 = vld [vmem:[%s5326_s1 + $0x488] sm:$0xff]  }
  0x78   : > { %3758 = vmatprep.subr.bf16.mxu0 %v4189_v19  ;;  %3779 = vmatpush3.bf16.msra.mxu1 %v4188_v18  ;;  %v4238_v18 = vld [vmem:[%s5326_s1 + $0x400] sm:$0xff]  }
  0x79   : > { %3780 = vmatprep.subr.bf16.mxu1 %v4191_v21  ;;  %v4239_v19 = vld [vmem:[%s5326_s1 + $0x4c0] sm:$0xff]   ;;  %v362_v21 = vld [vmem:[%s4503_s18 + $0xb4] sm:$0xff] }
  0x7b   : > { %3759 = vmatpush3.bf16.msra.mxu0 %v4190_v20  ;;  %v347_v20 = vld [vmem:[%s4503_s18 + $0x40] sm:$0xff] }
  0x7c   : > { %3760 = vmatprep.subr.bf16.mxu0 %v4193_v23  ;;  %3781 = vmatpush3.bf16.msra.mxu1 %v4192_v22  ;;  %v377_v22 = vmax.bf16 %v4337_v35, %v347_v20  ;;  %v392_v23 = vmax.bf16 %v4337_v35, %v362_v21  ;;  %v4278_v20 = vld [vmem:[%s5326_s1 + $0x630] sm:$0xff]  }
  0x7d   : > { %3782 = vmatprep.subr.bf16.mxu1 %v4195_v25  ;;  %v4241_v25 = vld [vmem:[%s5326_s1 + $0x578] sm:$0xff]   ;;  %v4279_v21 = vld [vmem:[%s5326_s1 + $0x6f0] sm:$0xff]  }
  0x7f   : > { %3761 = vmatpush3.bf16.msra.mxu0 %v4194_v24  ;;  %v4240_v24 = vld [vmem:[%s5326_s1 + $0x480] sm:$0xff]  }
  0x80   : > { %3762 = vmatprep.subr.bf16.mxu0 %v4197_v27  ;;  %3783 = vmatpush3.bf16.msra.mxu1 %v4196_v26  ;;  %v3372_v26 = vcombine.high %v377_v22, %v392_v23  ;;  %v3371_v27 = vcombine.low %v377_v22, %v392_v23  ;;  %v4280_v22 = vld [vmem:[%s5326_s1 + $0x6b0] sm:$0xff]   ;;  %v4281_v23 = vld [vmem:[%s5326_s1 + $0x668] sm:$0xff]  }
  0x81   : > { %3784 = vmatprep.subr.bf16.mxu1 %v4199_v29  ;;  %v363_v29 = vld [vmem:[%s4503_s18 + $0xbc] sm:$0xff] }
  0x83   : > { %3763 = vmatpush3.bf16.msra.mxu0 %v4198_v28  ;;  %v348_v28 = vld [vmem:[%s4503_s18 + $0x48] sm:$0xff] }
  0x84   : > { %3764 = vmatprep.subr.bf16.mxu0 %v4201_v31  ;;  %3785 = vmatpush3.bf16.msra.mxu1 %v4200_v30  ;;  %v378_v30 = vmax.bf16 %v4337_v35, %v348_v28  ;;  %v393_v31 = vmax.bf16 %v4337_v35, %v363_v29  ;;  %v4286_v28 = vld [vmem:[%s5326_s1 + $0x620] sm:$0xff]  }
  0x85   : > { %3786 = vmatprep.subr.bf16.mxu1 %v4203_v33  ;;  %v4243_v33 = vld [vmem:[%s5326_s1 + $0x5f8] sm:$0xff]   ;;  %v4287_v29 = vld [vmem:[%s5326_s1 + $0x6e0] sm:$0xff]  }
  0x87   : > { %3765 = vmatpush3.bf16.msra.mxu0 %v4202_v32  ;;  %v4242_v32 = vld [vmem:[%s5326_s1 + $0x538] sm:$0xff]  }
  0x88   : > { %3766 = vmatprep.subr.bf16.mxu0 %v4205_v36  ;;  %3787 = vmatpush3.bf16.msra.mxu1 %v4204_v34  ;;  %v3374_v34 = vcombine.high %v378_v30, %v393_v31  ;;  %v3373_v36 = vcombine.low %v378_v30, %v393_v31  ;;  %v4288_v30 = vld [vmem:[%s5326_s1 + $0x6a0] sm:$0xff]   ;;  %v4289_v31 = vld [vmem:[%s5326_s1 + $0x658] sm:$0xff]  }
  0x89   : > { %3788 = vmatprep.subr.bf16.mxu1 %v4207_v38  ;;  %v4245_v38 = vld [vmem:[%s5326_s1 + $0x570] sm:$0xff]  }
  0x8b   : > { %3767 = vmatpush3.bf16.msra.mxu0 %v4206_v37  ;;  %v4244_v37 = vld [vmem:[%s5326_s1 + $0x5b8] sm:$0xff]  }
  0x8c   : > { %3789 = vmatpush3.bf16.msra.mxu1 %v4208_v43  ;;  %3796 = vmatprep.subr.bf16.mxu0 %v4209_v44  ;;  %v4250_v43 = vld [vmem:[%s5326_s1 + $0x528] sm:$0xff]  }
  0x8d   : > { %3818 = vmatprep.subr.bf16.mxu1 %v4211_v52  ;;  %v4251_v44 = vld [vmem:[%s5326_s1 + $0x5e8] sm:$0xff]   ;;  %v4259_v52 = vld [vmem:[%s5326_s1 + $0x5d8] sm:$0xff]  }
  0x8e   : > { %2680 = vmatmul.mubr.bf16.vlgmr.msra.gmra.mxu0 %v3367_v47  ;;  %v4254_v47 = vld [vmem:[%s5326_s1 + $0x520] sm:$0xff]  }
  0x8f   : > { %3797 = vmatpush3.bf16.msra.mxu0 %v4210_v51  ;;  %2721 = vmatmul.mubr.bf16.vlgmr.msra.gmra.mxu1 %v3369_v54  ;;  %v4258_v51 = vld [vmem:[%s5326_s1 + $0x518] sm:$0xff]   ;;  %v4261_v54 = vld [vmem:[%s5326_s1 + $0x550] sm:$0xff]  }
  0x90   : > { %3798 = vmatprep.subr.bf16.mxu0 %v4213_v56  ;;  %3819 = vmatpush3.bf16.msra.mxu1 %v4212_v55  ;;  %v4262_v55 = vld [vmem:[%s5326_s1 + $0x510] sm:$0xff]  }
  0x91   : > { %3820 = vmatprep.subr.bf16.mxu1 %v4215_v58  ;;  %2761 = vmatprep.mubr.bf16.mxu0 %v3372_v26  ;;  %v4263_v56 = vld [vmem:[%s5326_s1 + $0x5d0] sm:$0xff]   ;;  %v4265_v58 = vld [vmem:[%s5326_s1 + $0x548] sm:$0xff]  }
  0x92   : > { %2802 = vmatprep.mubr.bf16.mxu1 %v3374_v34  ;;  %v4284_v26 = vld [vmem:[%s5326_s1 + $0x6a8] sm:$0xff]   ;;  %v4292_v34 = vld [vmem:[%s5326_s1 + $0x698] sm:$0xff]  }
  0x93   : > { %3799 = vmatpush3.bf16.msra.mxu0 %v4214_v57  ;;  %v4264_v57 = vld [vmem:[%s5326_s1 + $0x590] sm:$0xff]  }
  0x94   : > { %3800 = vmatprep.subr.bf16.mxu0 %v4217_v60  ;;  %3821 = vmatpush3.bf16.msra.mxu1 %v4216_v59  ;;  %v4266_v59 = vld [vmem:[%s5326_s1 + $0x508] sm:$0xff]  }
  0x95   : > { %3822 = vmatprep.subr.bf16.mxu1 %v4219_v62  ;;  %v4267_v60 = vld [vmem:[%s5326_s1 + $0x5c8] sm:$0xff]   ;;  %v4269_v62 = vld [vmem:[%s5326_s1 + $0x540] sm:$0xff]  }
  0x97   : > { %3801 = vmatpush3.bf16.msra.mxu0 %v4218_v61  ;;  %v4268_v61 = vld [vmem:[%s5326_s1 + $0x588] sm:$0xff]  }
  0x98   : > { %3802 = vmatprep.subr.bf16.mxu0 %v4221_v0  ;;  %3823 = vmatpush3.bf16.msra.mxu1 %v4220_v63  ;;  %v4270_v63 = vld [vmem:[%s5326_s1 + $0x500] sm:$0xff]  }
  0x99   : > { %3824 = vmatprep.subr.bf16.mxu1 %v4223_v2  ;;  %v4271_v0 = vld [vmem:[%s5326_s1 + $0x5c0] sm:$0xff]  }
  0x9a   : > { %v364_v2 = vld [vmem:[%s4503_s18 + $0xc4] sm:$0xff] }
  0x9b   : > { %3803 = vmatpush3.bf16.msra.mxu0 %v4222_v1  ;;  %v349_v1 = vld [vmem:[%s4503_s18 + $0x50] sm:$0xff] }
  0x9c   : > { %3804 = vmatprep.subr.bf16.mxu0 %v4225_v4  ;;  %3825 = vmatpush3.bf16.msra.mxu1 %v4224_v3  ;;  %v379_v3 = vmax.bf16 %v4337_v35, %v349_v1  ;;  %v394_v4 = vmax.bf16 %v4337_v35, %v364_v2  ;;  %v4310_v1 = vld [vmem:[%s5326_s1 + $0x710] sm:$0xff]   ;;  %v4311_v2 = vld [vmem:[%s5326_s1 + $0x708] sm:$0xff]  }
  0x9d   : > { %3826 = vmatprep.subr.bf16.mxu1 %v4227_v6  ;;  %v4273_v6 = vld [vmem:[%s5326_s1 + $0x678] sm:$0xff]  }
  0x9f   : > { %3805 = vmatpush3.bf16.msra.mxu0 %v4226_v5  ;;  %v4272_v5 = vld [vmem:[%s5326_s1 + $0x580] sm:$0xff]  }
  0xa0   : > { %3806 = vmatprep.subr.bf16.mxu0 %v4229_v8  ;;  %3827 = vmatpush3.bf16.msra.mxu1 %v4228_v7  ;;  %v350_v7 = vld [vmem:[%s4503_s18 + $0x58] sm:$0xff]  ;;  %v365_v8 = vld [vmem:[%s4503_s18 + $0xcc] sm:$0xff] }
  0xa1   : > { %3828 = vmatprep.subr.bf16.mxu1 %v4231_v10  ;;  %v3375_v10 = vcombine.low %v379_v3, %v394_v4 }
  0xa3   : > { %3807 = vmatpush3.bf16.msra.mxu0 %v4230_v9  ;;  %v3376_v9 = vcombine.high %v379_v3, %v394_v4  ;;  %v353_v3 = vld [vmem:[%s4503_s18 + $0x70] sm:$0xf]  ;;  %v368_v4 = vld [vmem:[%s4503_s18 + $0xe4] sm:$0xf] }
  0xa4   : > { %3808 = vmatprep.subr.bf16.mxu0 %v4233_v12  ;;  %3829 = vmatpush3.bf16.msra.mxu1 %v4232_v11  ;;  %v380_v11 = vmax.bf16 %v4337_v35, %v350_v7  ;;  %v395_v12 = vmax.bf16 %v4337_v35, %v365_v8  ;;  %v4312_v7 = vld [vmem:[%s5326_s1 + $0x700] sm:$0xff]  }
  0xa5   : > { %3830 = vmatprep.subr.bf16.mxu1 %v4235_v14  ;;  %v4275_v14 = vld [vmem:[%s5326_s1 + $0x6f8] sm:$0xff]  }
  0xa7   : > { %3809 = vmatpush3.bf16.msra.mxu0 %v4234_v13  ;;  %v4274_v13 = vld [vmem:[%s5326_s1 + $0x638] sm:$0xff]  }
  0xa8   : > { %3810 = vmatprep.subr.bf16.mxu0 %v4237_v17  ;;  %3831 = vmatpush3.bf16.msra.mxu1 %v4236_v15  ;;  %v3378_v15 = vcombine.high %v380_v11, %v395_v12  ;;  %v3377_v17 = vcombine.low %v380_v11, %v395_v12  ;;  %v3045_v11 = vld [vmem:[%s5327_s2 + $0x60] sm:$0xff]  ;;  %v3044_v12 = vld [vmem:[%s5327_s2 + $0x58] sm:$0xff] }
  0xa9   : > { %3832 = vmatprep.subr.bf16.mxu1 %v4239_v19  ;;  %v4277_v19 = vld [vmem:[%s5326_s1 + $0x670] sm:$0xff]  }
  0xab   : > { %3811 = vmatpush3.bf16.msra.mxu0 %v4238_v18  ;;  %v4276_v18 = vld [vmem:[%s5326_s1 + $0x6b8] sm:$0xff]  }
  0xac   : > { %3840 = vmatprep.subr.bf16.mxu0 %v4241_v25  ;;  %3833 = vmatpush3.bf16.msra.mxu1 %v4240_v24  ;;  %v4282_v24 = vld [vmem:[%s5326_s1 + $0x628] sm:$0xff]  }
  0xad   : > { %3862 = vmatprep.subr.bf16.mxu1 %v4243_v33  ;;  %v4283_v25 = vld [vmem:[%s5326_s1 + $0x6e8] sm:$0xff]   ;;  %v4291_v33 = vld [vmem:[%s5326_s1 + $0x6d8] sm:$0xff]  }
  0xae   : > { %2762 = vmatmul.mubr.bf16.vlgmr.msra.gmra.mxu0 %v3371_v27  ;;  %v4285_v27 = vld [vmem:[%s5326_s1 + $0x660] sm:$0xff]  }
  0xaf   : > { %3841 = vmatpush3.bf16.msra.mxu0 %v4242_v32  ;;  %2803 = vmatmul.mubr.bf16.vlgmr.msra.gmra.mxu1 %v3373_v36  ;;  %v4290_v32 = vld [vmem:[%s5326_s1 + $0x618] sm:$0xff]   ;;  %v4293_v36 = vld [vmem:[%s5326_s1 + $0x650] sm:$0xff]  }
  0xb0   : > { %3842 = vmatprep.subr.bf16.mxu0 %v4245_v38  ;;  %3863 = vmatpush3.bf16.msra.mxu1 %v4244_v37  ;;  %v4294_v37 = vld [vmem:[%s5326_s1 + $0x610] sm:$0xff]  }
  0xb1   : > { %3864 = vmatprep.subr.bf16.mxu1 %v4247_v40  ;;  %2843 = vmatprep.mubr.bf16.mxu0 %v3376_v9  ;;  %v4295_v38 = vld [vmem:[%s5326_s1 + $0x6d0] sm:$0xff]   ;;  %v4297_v40 = vld [vmem:[%s5326_s1 + $0x648] sm:$0xff]   ;;  %v3048_v9 = vld [vmem:[%s5327_s2 + $0x78] sm:$0xff] }
  0xb2   : > { %2884 = vmatprep.mubr.bf16.mxu1 %v3378_v15  ;;  %v3041_v15 = vld [vmem:[%s5327_s2 + $0x40] sm:$0xff] }
  0xb3   : > { %3843 = vmatpush3.bf16.msra.mxu0 %v4246_v39  ;;  %v4296_v39 = vld [vmem:[%s5326_s1 + $0x690] sm:$0xff]  }
  0xb4   : > { %3844 = vmatprep.subr.bf16.mxu0 %v4249_v42  ;;  %3865 = vmatpush3.bf16.msra.mxu1 %v4248_v41  ;;  %v4298_v41 = vld [vmem:[%s5326_s1 + $0x608] sm:$0xff]  }
  0xb5   : > { %3866 = vmatprep.subr.bf16.mxu1 %v4251_v44  ;;  %v4299_v42 = vld [vmem:[%s5326_s1 + $0x6c8] sm:$0xff]   ;;  %v4301_v44 = vld [vmem:[%s5326_s1 + $0x640] sm:$0xff]  }
  0xb7   : > { %3845 = vmatpush3.bf16.msra.mxu0 %v4250_v43  ;;  %v4300_v43 = vld [vmem:[%s5326_s1 + $0x688] sm:$0xff]  }
  0xb8   : > { %3846 = vmatprep.subr.bf16.mxu0 %v4253_v46  ;;  %3867 = vmatpush3.bf16.msra.mxu1 %v4252_v45  ;;  %v4302_v45 = vld [vmem:[%s5326_s1 + $0x600] sm:$0xff]  }
  0xb9   : > { %3868 = vmatprep.subr.bf16.mxu1 %v4255_v48  ;;  %v4303_v46 = vld [vmem:[%s5326_s1 + $0x6c0] sm:$0xff]   ;;  %v366_v48 = vld [vmem:[%s4503_s18 + $0xd4] sm:$0xff] }
  0xbb   : > { %3847 = vmatpush3.bf16.msra.mxu0 %v4254_v47  ;;  %v351_v47 = vld [vmem:[%s4503_s18 + $0x60] sm:$0xff] }
  0xbc   : > { %3848 = vmatprep.subr.bf16.mxu0 %v4257_v50  ;;  %3869 = vmatpush3.bf16.msra.mxu1 %v4256_v49  ;;  %v381_v49 = vmax.bf16 %v4337_v35, %v351_v47  ;;  %v396_v50 = vmax.bf16 %v4337_v35, %v366_v48 }
  0xbd   : > { %3870 = vmatprep.subr.bf16.mxu1 %v4259_v52  ;;  %v352_v52 = vld [vmem:[%s4503_s18 + $0x68] sm:$0xff] }
  0xbf   : > { %3849 = vmatpush3.bf16.msra.mxu0 %v4258_v51  ;;  %v4304_v51 = vld [vmem:[%s5326_s1 + $0x680] sm:$0xff]  }
  0xc0   : > { %3850 = vmatprep.subr.bf16.mxu0 %v4261_v54  ;;  %3871 = vmatpush3.bf16.msra.mxu1 %v4260_v53  ;;  %v367_v53 = vld [vmem:[%s4503_s18 + $0xdc] sm:$0xff]  ;;  %v382_v54 = vmax.bf16 %v4337_v35, %v352_v52 }
  0xc1   : > { %3872 = vmatprep.subr.bf16.mxu1 %v4263_v56  ;;  %v3379_v56 = vcombine.low %v381_v49, %v396_v50 }
  0xc3   : > { %3851 = vmatpush3.bf16.msra.mxu0 %v4262_v55  ;;  %v3380_v55 = vcombine.high %v381_v49, %v396_v50 }
  0xc4   : > { %3852 = vmatprep.subr.bf16.mxu0 %v4265_v58  ;;  %3873 = vmatpush3.bf16.msra.mxu1 %v4264_v57  ;;  %v397_v57 = vmax.bf16 %v4337_v35, %v367_v53  ;;  %v4305_v58 = vld [vmem:[%s5326_s1 + $0x738] sm:$0xff]  }
  0xc5   : > { %3874 = vmatprep.subr.bf16.mxu1 %v4267_v60 }
  0xc6   : > { %v3381_v60 = vcombine.low %v382_v54, %v397_v57 }
  0xc7   : > { %3853 = vmatpush3.bf16.msra.mxu0 %v4266_v59  ;;  %v3382_v59 = vcombine.high %v382_v54, %v397_v57 }
  0xc8   : > { %3854 = vmatprep.subr.bf16.mxu0 %v4269_v62  ;;  %3875 = vmatpush3.bf16.msra.mxu1 %v4268_v61  ;;  %v4306_v61 = vld [vmem:[%s5326_s1 + $0x730] sm:$0xff]   ;;  %v4307_v62 = vld [vmem:[%s5326_s1 + $0x728] sm:$0xff]  }
  0xc9   : > { %3876 = vmatprep.subr.bf16.mxu1 %v4271_v0  ;;  %v4309_v0 = vld [vmem:[%s5326_s1 + $0x718] sm:$0xff]  }
  0xcb   : > { %3855 = vmatpush3.bf16.msra.mxu0 %v4270_v63  ;;  %v4308_v63 = vld [vmem:[%s5326_s1 + $0x720] sm:$0xff]  }
  0xcc   : > { %3877 = vmatpush3.bf16.msra.mxu1 %v4272_v5  ;;  %3884 = vmatprep.subr.bf16.mxu0 %v4273_v6  ;;  %v383_v5 = vmax.bf16 %v4337_v35, %v353_v3  ;;  %v398_v6 = vmax.bf16 %v4337_v35, %v368_v4  ;;  %v3047_v35 = vld [vmem:[%s5327_s2 + $0x70] sm:$0xff] }
  0xcd   : > { %3906 = vmatprep.subr.bf16.mxu1 %v4275_v14  ;;  %v3042_v14 = vld [vmem:[%s5327_s2 + $0x48] sm:$0xff] }
  0xce   : > { %2844 = vmatmul.mubr.bf16.vlgmr.msra.gmra.mxu0 %v3375_v10  ;;  %v3383_v8 = vcombine.low %v383_v5, %v398_v6  ;;  %v3046_v10 = vld [vmem:[%s5327_s2 + $0x68] sm:$0xff] }
  0xcf   : > { %3885 = vmatpush3.bf16.msra.mxu0 %v4274_v13  ;;  %2885 = vmatmul.mubr.bf16.vlgmr.msra.gmra.mxu1 %v3377_v17  ;;  %v3043_v13 = vld [vmem:[%s5327_s2 + $0x50] sm:$0xff]  ;;  %v3040_v17 = vld [vmem:[%s5327_s2 + $0x38] sm:$0xff] }
  0xd0   : > { %3886 = vmatprep.subr.bf16.mxu0 %v4277_v19  ;;  %3907 = vmatpush3.bf16.msra.mxu1 %v4276_v18  ;;  %v3039_v18 = vld [vmem:[%s5327_s2 + $0x30] sm:$0xff]  ;;  %v3038_v19 = vld [vmem:[%s5327_s2 + $0x28] sm:$0xff] }
  0xd1   : > { %3908 = vmatprep.subr.bf16.mxu1 %v4279_v21  ;;  %2925 = vmatprep.mubr.bf16.mxu0 %v3380_v55  ;;  %v3037_v21 = vld [vmem:[%s5327_s2 + $0x20] sm:$0xff] }
  0xd2   : > { %2966 = vmatprep.mubr.bf16.mxu1 %v3382_v59 }
  0xd3   : > { %3887 = vmatpush3.bf16.msra.mxu0 %v4278_v20 }
  0xd4   : > { %3888 = vmatprep.subr.bf16.mxu0 %v4281_v23  ;;  %3909 = vmatpush3.bf16.msra.mxu1 %v4280_v22  ;;  %v3036_v22 = vld [vmem:[%s5327_s2 + $0x18] sm:$0xff]  ;;  %v3035_v23 = vld [vmem:[%s5327_s2 + $0x10] sm:$0xff] }
  0xd5   : > { %3910 = vmatprep.subr.bf16.mxu1 %v4283_v25 }
  0xd7   : > { %3889 = vmatpush3.bf16.msra.mxu0 %v4282_v24 }
  0xd8   : > { %3890 = vmatprep.subr.bf16.mxu0 %v4285_v27  ;;  %3911 = vmatpush3.bf16.msra.mxu1 %v4284_v26  ;;  %v3034_v26 = vld [vmem:[%s5327_s2 + $0x8] sm:$0xff]  ;;  %v3033_v27 = vld [vmem:[%s5327_s2] sm:$0xff] }
  0xd9   : > { %3912 = vmatprep.subr.bf16.mxu1 %v4287_v29 }
  0xdb   : > { %3891 = vmatpush3.bf16.msra.mxu0 %v4286_v28 }
  0xdc   : > { %3892 = vmatprep.subr.bf16.mxu0 %v4289_v31  ;;  %3913 = vmatpush3.bf16.msra.mxu1 %v4288_v30  ;;  %v3128_v30 = vld [vmem:[%s5329_s4 + $0x38] sm:$0xff]  ;;  %v3127_v31 = vld [vmem:[%s5329_s4 + $0x30] sm:$0xff] }
  0xdd   : > { %3914 = vmatprep.subr.bf16.mxu1 %v4291_v33 }
  0xdf   : > { %3893 = vmatpush3.bf16.msra.mxu0 %v4290_v32 }
  0xe0   : > { %3894 = vmatprep.subr.bf16.mxu0 %v4293_v36  ;;  %3915 = vmatpush3.bf16.msra.mxu1 %v4292_v34  ;;  %v3126_v34 = vld [vmem:[%s5329_s4 + $0x28] sm:$0xff] }
  0xe1   : > { %3916 = vmatprep.subr.bf16.mxu1 %v4295_v38 }
  0xe3   : > { %3895 = vmatpush3.bf16.msra.mxu0 %v4294_v37  ;;  %v3125_v37 = vld [vmem:[%s5329_s4 + $0x20] sm:$0xff] }
  0xe4   : > { %3896 = vmatprep.subr.bf16.mxu0 %v4297_v40  ;;  %3917 = vmatpush3.bf16.msra.mxu1 %v4296_v39  ;;  %v3124_v39 = vld [vmem:[%s5329_s4 + $0x18] sm:$0xff] }
  0xe5   : > { %3918 = vmatprep.subr.bf16.mxu1 %v4299_v42 }
  0xe7   : > { %3897 = vmatpush3.bf16.msra.mxu0 %v4298_v41 }
  0xe8   : > { %3898 = vmatprep.subr.bf16.mxu0 %v4301_v44  ;;  %3919 = vmatpush3.bf16.msra.mxu1 %v4300_v43 }
  0xe9   : > { %3920 = vmatprep.subr.bf16.mxu1 %v4303_v46 }
  0xeb   : > { %3899 = vmatpush3.bf16.msra.mxu0 %v4302_v45 }
  0xec   : > { %3968 = vmatprep.subr.bf16.mxu0 %v4338_v16  ;;  %3921 = vmatpush3.bf16.msra.mxu1 %v4304_v51 }
  0xed   : > { %3988 = vmatprep.subr.mxu1 %v4338_v16 }
  0xee   : > { %2926 = vmatmul.mubr.bf16.vlgmr.msra.gmra.mxu0 %v3379_v56  ;;  %v5231_v20 = vpop.f32.mrf.mxu0 }
  0xef   : > { %3969 = vmatpush3.bf16.msra.mxu0 %v4305_v58  ;;  %2967 = vmatmul.mubr.bf16.vlgmr.msra.gmra.mxu1 %v3381_v60  ;;  %v3658_v24 = vpop.f32.mrf.mxu1 }
  0xf0   : > { %3970 = vmatprep.subr.bf16.mxu0 %v4338_v16  ;;  %3984 = vmatprep.mubr.msk.bf16.mxu0 %vm4339_vm0, %v4338_v16  ;;  %v3637_v25 = vpop.f32.mrf.mxu0 }
  0xf1   : > { %4020 = vmatprep.mubr.msk.f32.mxu1 %vm4339_vm0, %v4338_v16  ;;  %3989 = vmatpush3.msra.mxu1 %v3048_v9  ;;  %v3659_v28 = vpop.f32.mrf.mxu1  ;;  %v3638_v4 = vadd.f32 %v3637_v25, %v5231_v20 }
  0xf2   : > { %3990 = vmatprep.subr.mxu1 %v4338_v16  ;;  %v3639_v29 = vpop.f32.mrf.mxu0  ;;  %v3660_v5 = vadd.f32 %v3659_v28, %v3658_v24 }
  0xf3   : > { %3971 = vmatpush3.bf16.msra.mxu0 %v4306_v61  ;;  %3991 = vmatpush3.msra.mxu1 %v3047_v35  ;;  %v3661_v32 = vpop.f32.mrf.mxu1 }
  0xf4   : > { %3972 = vmatprep.subr.bf16.mxu0 %v4338_v16  ;;  %3992 = vmatprep.subr.mxu1 %v4338_v16  ;;  %v3640_v33 = vpop.f32.mrf.mxu0 }
  0xf5   : > { %3993 = vmatpush3.msra.mxu1 %v3046_v10  ;;  %v3662_v38 = vpop.f32.mrf.mxu1  ;;  %v3641_v6 = vadd.f32 %v3640_v33, %v3639_v29  ;;  %v2477_v10 = vadd.f32 %v3660_v5, %v3638_v4 }
  0xf6   : > { %3994 = vmatprep.subr.mxu1 %v4338_v16 }
  0xf7   : > { %3973 = vmatpush3.bf16.msra.mxu0 %v4307_v62  ;;  %3995 = vmatpush3.msra.mxu1 %v3045_v11 }
  0xf8   : > { %3974 = vmatprep.subr.bf16.mxu0 %v4338_v16  ;;  %3996 = vmatprep.subr.mxu1 %v4338_v16 }
  0xf9   : > { %3997 = vmatpush3.msra.mxu1 %v3044_v12 }
  0xfa   : > { %3998 = vmatprep.subr.mxu1 %v4338_v16 }
  0xfb   : > { %3975 = vmatpush3.bf16.msra.mxu0 %v4308_v63  ;;  %3999 = vmatpush3.msra.mxu1 %v3043_v13 }
  0xfc   : > { %3976 = vmatprep.subr.bf16.mxu0 %v4338_v16  ;;  %4000 = vmatprep.subr.mxu1 %v4338_v16 }
  0xfd   : > { %4001 = vmatpush3.msra.mxu1 %v3042_v14 }
  0xfe   : > { %4002 = vmatprep.subr.mxu1 %v4338_v16 }
  0xff   : > { %3977 = vmatpush3.bf16.msra.mxu0 %v4309_v0  ;;  %4003 = vmatpush3.msra.mxu1 %v3041_v15 }
 0x100   : > { %3978 = vmatprep.subr.bf16.mxu0 %v4338_v16  ;;  %4004 = vmatprep.subr.mxu1 %v4338_v16 }
 0x101   : > { %4005 = vmatpush3.msra.mxu1 %v3040_v17 }
 0x102   : > { %4006 = vmatprep.subr.mxu1 %v4338_v16 }
 0x103   : > { %3979 = vmatpush3.bf16.msra.mxu0 %v4310_v1  ;;  %4007 = vmatpush3.msra.mxu1 %v3039_v18 }
 0x104   : > { %3980 = vmatprep.subr.bf16.mxu0 %v4338_v16  ;;  %4008 = vmatprep.subr.mxu1 %v4338_v16 }
 0x105   : > { %4009 = vmatpush3.msra.mxu1 %v3038_v19 }
 0x106   : > { %4010 = vmatprep.subr.mxu1 %v4338_v16 }
 0x107   : > { %3981 = vmatpush3.bf16.msra.mxu0 %v4311_v2  ;;  %4011 = vmatpush3.msra.mxu1 %v3037_v21 }
 0x108   : > { %3982 = vmatprep.subr.bf16.mxu0 %v4338_v16  ;;  %4012 = vmatprep.subr.mxu1 %v4338_v16 }
 0x109   : > { %4013 = vmatpush3.msra.mxu1 %v3036_v22 }
 0x10a   : > { %4014 = vmatprep.subr.mxu1 %v4338_v16 }
 0x10b   : > { %3983 = vmatpush3.bf16.msra.mxu0 %v4312_v7  ;;  %4015 = vmatpush3.msra.mxu1 %v3035_v23  ;;  %v3663_v7 = vadd.f32 %v3662_v38, %v3661_v32 }
 0x10c   : > { %4023 = vmatprep.subr.mxu0 %v4338_v16  ;;  %4016 = vmatprep.subr.mxu1 %v4338_v16 }
 0x10d   : > { %4017 = vmatpush3.msra.mxu1 %v3034_v26  ;;  %v2480_v13 = vadd.f32 %v3663_v7, %v3641_v6 }
 0x10e   : > { %3985 = vmatmul.mubr.bf16.vlgmr.msra.gmra.mxu0 %v3383_v8  ;;  %4018 = vmatprep.subr.mxu1 %v4338_v16  ;;  %v3680_v36 = vpop.f32.mrf.mxu0 }
 0x10f   : > { %4039 = vmatprep.mubr.msk.f32.mxu0 %vm4339_vm0, %v4338_v16  ;;  %4019 = vmatpush3.msra.mxu1 %v3033_v27  ;;  %v3702_v41 = vpop.f32.mrf.mxu1 }
 0x110   : > { %4042 = vmatprep.subr.mxu1 %v4338_v16  ;;  %4024 = vmatpush3.msra.mxu0 %v3128_v30  ;;  %v3681_v40 = vpop.f32.mrf.mxu0 }
 0x111   : > { %4025 = vmatprep.subr.mxu0 %v4338_v16  ;;  %v3703_v43 = vpop.f32.mrf.mxu1  ;;  %v3682_v8 = vadd.f32 %v3681_v40, %v3680_v36 }
 0x112   : > { %4026 = vmatpush3.msra.mxu0 %v3127_v31  ;;  %v3683_v42 = vpop.f32.mrf.mxu0  ;;  %v3704_v15 = vadd.f32 %v3703_v43, %v3702_v41 }
 0x113   : > { %4027 = vmatprep.subr.mxu0 %v4338_v16  ;;  %v3705_v45 = vpop.f32.mrf.mxu1  ;;  %v2518_v14 = vadd.f32 %v3682_v8, %v2477_v10 }
 0x114   : > { %4028 = vmatpush3.msra.mxu0 %v3126_v34  ;;  %v3684_v44 = vpop.f32.mrf.mxu0 }
 0x115   : > { %4029 = vmatprep.subr.mxu0 %v4338_v16  ;;  %v3706_v47 = vpop.f32.mrf.mxu1  ;;  %v3685_v11 = vadd.f32 %v3684_v44, %v3683_v42  ;;  %v2559_v26 = vadd.f32 %v3704_v15, %v2518_v14 }
 0x116   : > { %4030 = vmatpush3.msra.mxu0 %v3125_v37  ;;  %v3707_v19 = vadd.f32 %v3706_v47, %v3705_v45 }
 0x117   : > { %4031 = vmatprep.subr.mxu0 %v4338_v16  ;;  %v2521_v18 = vadd.f32 %v3685_v11, %v2480_v13 }
 0x118   : > { %4032 = vmatpush3.msra.mxu0 %v3124_v39 }
 0x119   : > { %4033 = vmatprep.subr.mxu0 %v4338_v16  ;;  %v2562_v24 = vadd.f32 %v3707_v19, %v2521_v18 }
 0x12e   : > { %v3724_v46 = vpop.f32.mrf.mxu0 }
 0x12f   : > { %v3746_v49 = vpop.f32.mrf.mxu1 }
 0x130   : > { %v3725_v48 = vpop.f32.mrf.mxu0 }
 0x131   : > { %v3747_v51 = vpop.f32.mrf.mxu1  ;;  %v3726_v21 = vadd.f32 %v3725_v48, %v3724_v46 }
 0x132   : > { %v3727_v50 = vpop.f32.mrf.mxu0  ;;  %v3748_v27 = vadd.f32 %v3747_v51, %v3746_v49 }
 0x133   : > { %v3749_v53 = vpop.f32.mrf.mxu1  ;;  %v2600_v25 = vadd.f32 %v3726_v21, %v2559_v26 }
 0x134   : > { %v3728_v52 = vpop.f32.mrf.mxu0 }
 0x135   : > { %v3750_v55 = vpop.f32.mrf.mxu1  ;;  %v3729_v20 = vadd.f32 %v3728_v52, %v3727_v50  ;;  %v2641_v33 = vadd.f32 %v3748_v27, %v2600_v25 }
 0x136   : > { %v3751_v31 = vadd.f32 %v3750_v55, %v3749_v53 }
 0x137   : > { %v2603_v30 = vadd.f32 %v3729_v20, %v2562_v24 }
 0x139   : > { %v2644_v38 = vadd.f32 %v3751_v31, %v2603_v30 }
 0x14e   : > { %v3768_v54 = vpop.f32.mrf.mxu0 }
 0x14f   : > { %v3790_v57 = vpop.f32.mrf.mxu1 }
 0x150   : > { %v3769_v56 = vpop.f32.mrf.mxu0 }
 0x151   : > { %v3791_v59 = vpop.f32.mrf.mxu1  ;;  %v3770_v32 = vadd.f32 %v3769_v56, %v3768_v54 }
 0x152   : > { %v3771_v58 = vpop.f32.mrf.mxu0  ;;  %v3792_v40 = vadd.f32 %v3791_v59, %v3790_v57 }
 0x153   : > { %v3793_v61 = vpop.f32.mrf.mxu1  ;;  %v2682_v39 = vadd.f32 %v3770_v32, %v2641_v33  ;;  %v3123_v33 = vld [vmem:[%s5329_s4 + $0x10] sm:$0xff] }
 0x154   : > { %v3772_v60 = vpop.f32.mrf.mxu0  ;;  %4034 = vmatpush3.msra.mxu0 %v3123_v33 }
 0x155   : > { %v3794_v63 = vpop.f32.mrf.mxu1  ;;  %v3773_v34 = vadd.f32 %v3772_v60, %v3771_v58  ;;  %v2723_v46 = vadd.f32 %v3792_v40, %v2682_v39  ;;  %4035 = vmatprep.subr.mxu0 %v4338_v16 }
 0x156   : > { %v3795_v43 = vadd.f32 %v3794_v63, %v3793_v61 }
 0x157   : > { %v2685_v42 = vadd.f32 %v3773_v34, %v2644_v38  ;;  %v3122_v34 = vld [vmem:[%s5329_s4 + $0x8] sm:$0xff]  ;;  %v3049_v38 = vld [vmem:[%s5328_s3] sm:$0x1] }
 0x158   : > { %4036 = vmatpush3.msra.mxu0 %v3122_v34 }
 0x159   : > { %v2726_v50 = vadd.f32 %v3795_v43, %v2685_v42  ;;  %4037 = vmatprep.subr.mxu0 %v4338_v16  ;;  %v3207_v43 = vld [vmem:[%s5331_s6 + $0x10] sm:$0xff] }
 0x16e   : > { %v3812_v62 = vpop.f32.mrf.mxu0 }
 0x16f   : > { %v3834_v1 = vpop.f32.mrf.mxu1 }
 0x170   : > { %v3813_v0 = vpop.f32.mrf.mxu0 }
 0x171   : > { %v3835_v3 = vpop.f32.mrf.mxu1  ;;  %v3814_v44 = vadd.f32 %v3813_v0, %v3812_v62 }
 0x172   : > { %v3815_v2 = vpop.f32.mrf.mxu0  ;;  %v3836_v52 = vadd.f32 %v3835_v3, %v3834_v1 }
 0x173   : > { %v3837_v35 = vpop.f32.mrf.mxu1  ;;  %v2764_v51 = vadd.f32 %v3814_v44, %v2723_v46  ;;  %v3206_v44 = vld [vmem:[%s5331_s6 + $0x8] sm:$0xff]  ;;  %v3129_v46 = vld [vmem:[%s5330_s5] sm:$0x1] }
 0x174   : > { %v3816_v9 = vpop.f32.mrf.mxu0 }
 0x175   : > { %v3838_v17 = vpop.f32.mrf.mxu1  ;;  %v3817_v47 = vadd.f32 %v3816_v9, %v3815_v2  ;;  %v2805_v60 = vadd.f32 %v3836_v52, %v2764_v51  ;;  %v3209_v51 = vld [vmem:[%s5332_s7] sm:$0x1] }
 0x176   : > { %v3839_v54 = vadd.f32 %v3838_v17, %v3837_v35 }
 0x177   : > { %v2767_v53 = vadd.f32 %v3817_v47, %v2726_v50 }
 0x179   : > { %v2808_v57 = vadd.f32 %v3839_v54, %v2767_v53 }
 0x18e   : > { %v3856_v12 = vpop.f32.mrf.mxu0 }
 0x18f   : > { %v3878_v23 = vpop.f32.mrf.mxu1 }
 0x190   : > { %v3857_v22 = vpop.f32.mrf.mxu0 }
 0x191   : > { %v3879_v29 = vpop.f32.mrf.mxu1  ;;  %v3858_v55 = vadd.f32 %v3857_v22, %v3856_v12 }
 0x192   : > { %v3859_v28 = vpop.f32.mrf.mxu0  ;;  %v3880_v5 = vadd.f32 %v3879_v29, %v3878_v23 }
 0x193   : > { %v3881_v37 = vpop.f32.mrf.mxu1  ;;  %v2846_v59 = vadd.f32 %v3858_v55, %v2805_v60 }
 0x194   : > { %v3860_v36 = vpop.f32.mrf.mxu0 }
 0x195   : > { %v3882_v45 = vpop.f32.mrf.mxu1  ;;  %v3861_v4 = vadd.f32 %v3860_v36, %v3859_v28  ;;  %v2887_v6 = vadd.f32 %v3880_v5, %v2846_v59  ;;  %v3018_v28 = vld [vmem:[#allocation2] sm:$0x1] }
 0x196   : > { %v3883_v0 = vadd.f32 %v3882_v45, %v3881_v37  ;;  %v3121_v36 = vld [vmem:[%s5329_s4] sm:$0xff]  ;;  %v3208_v37 = vld [vmem:[%s5331_s6 + $0x18] sm:$0xff] }
 0x197   : > { %v2849_v63 = vadd.f32 %v3861_v4, %v2808_v57  ;;  %4038 = vmatpush3.msra.mxu0 %v3121_v36  ;;  %v3205_v45 = vld [vmem:[%s5331_s6] sm:$0xff] }
 0x199   : > { %v2890_v9 = vadd.f32 %v3883_v0, %v2849_v63 }
 0x1ae   : > { %v3900_v41 = vpop.f32.mrf.mxu0 }
 0x1af   : > { %v3922_v49 = vpop.f32.mrf.mxu1 }
 0x1b0   : > { %v3901_v48 = vpop.f32.mrf.mxu0 }
 0x1b1   : > { %v3923_v58 = vpop.f32.mrf.mxu1  ;;  %v3902_v2 = vadd.f32 %v3901_v48, %v3900_v41 }
 0x1b2   : > { %v3903_v56 = vpop.f32.mrf.mxu0  ;;  %v3924_v3 = vadd.f32 %v3923_v58, %v3922_v49 }
 0x1b3   : > { %v3925_v62 = vpop.f32.mrf.mxu1  ;;  %v2928_v1 = vadd.f32 %v3902_v2, %v2887_v6 }
 0x1b4   : > { %v3904_v61 = vpop.f32.mrf.mxu0 }
 0x1b5   : > { %v3905_v7 = vadd.f32 %v3904_v61, %v3903_v56  ;;  %v3926_v8 = vpop.f32.mrf.mxu1  ;;  %v2969_v12 = vadd.f32 %v3924_v3, %v2928_v1 }
 0x1b6   : > { %v3927_v10 = vadd.f32 %v3926_v8, %v3925_v62 }
 0x1b7   : > { %v2931_v35 = vadd.f32 %v3905_v7, %v2890_v9 }
 0x1b9   : > { %v2972_v15 = vadd.f32 %v3927_v10, %v2931_v35 }
 0x1ce   : > { %v3009_v11 = vpop.f32.mrf.mxu0 }
 0x1cf   : > { %v3010_v14 = vadd.f32 %v3009_v11, %v2969_v12 }
 0x1d0   : > { %v3986_v13 = vpop.f32.mrf.mxu0 }
 0x1d1   : > { %v3016_v21 = vmax.f32 %v3010_v14, 0.0 }
 0x1d2   : > { %v3012_v17 = vpop.f32.mrf.mxu0 }
 0x1d3   : > { %v3013_v18 = vadd.f32 %v3012_v17, %v2972_v15 }
 0x1d4   : > { %v3987_v19 = vpop.f32.mrf.mxu0 }
 0x1d5   : > { %v3017_v22 = vmax.f32 %v3013_v18, 0.0 }
 0x1d7   : > { %v3019_v23 = vadd.f32 %v3017_v22, %v3016_v21 }
 0x1d9   : > { %v3020_v26 = vrot.slane %v3019_v23, 4 }
 0x1db   : > { %v3021_v20 = vadd.f32 %v3020_v26, %v3019_v23 }
 0x1dd   : > { %v3022_v24 = vrot.slane %v3021_v20, 2 }
 0x1df   : > { %v3023_v25 = vadd.f32 %v3022_v24, %v3021_v20 }
 0x1e1   : > { %v3024_v27 = vrot.slane %v3023_v25, 1 }
 0x1e3   : > { %v3025_v29 = vadd.f32 %v3024_v27, %v3023_v25 }
 0x1e5   : > { %v3026_v30 = vadd.f32 %v3025_v29, %v3018_v28 }
 0x1e7   : > { %3027 = vst [vmem:[#allocation2] sm:$0x1] %v3026_v30 }
 0x1ee   : > { %v3031_v31 = vld [vmem:[#allocation2] sm:$0x1] }
 0x1ef   : > { %v3032_v32 = vmul.f32 0.0625, %v3031_v31 }
 0x1f1   : > { %4021 = vmatmul.mubr.f32.vlgmr.msra.gmra.mxu1 %v3032_v32 }
 0x1f2   : > { %4050 = vmatprep.mubr.msk.f32.mxu1 %vm4339_vm0, %v4338_v16  ;;  %4043 = vmatpush3.msra.mxu1 %v3208_v37 }
 0x1f3   : > { %4044 = vmatprep.subr.mxu1 %v4338_v16 }
 0x1f4   : > { %4045 = vmatpush3.msra.mxu1 %v3207_v43 }
 0x1f5   : > { %4046 = vmatprep.subr.mxu1 %v4338_v16 }
 0x1f6   : > { %4047 = vmatpush3.msra.mxu1 %v3206_v44 }
 0x1f7   : > { %4048 = vmatprep.subr.mxu1 %v4338_v16 }
 0x1f8   : > { %4049 = vmatpush3.msra.mxu1 %v3205_v45 }
 0x2b1   : > { %v3116_v39 = vpop.f32.mrf.mxu1 }
 0x2b2   : > { %v3117_v40 = vadd.f32 %v3116_v39, %v3049_v38 }
 0x2b3   : > { %v4022_v41 = vpop.f32.mrf.mxu1 }
 0x2b4   : > { %v3120_v42 = vmax.f32 %v3117_v40, 0.0 }
 0x2b6   : > { %4040 = vmatmul.mubr.msk.f32.vlgmr.msra.gmra.mxu0 %vm3130_vm1, %v3120_v42 }
 0x376   : > { %v3200_v47 = vpop.f32.mrf.mxu0 }
 0x377   : > { %v3201_v48 = vadd.f32 %v3200_v47, %v3129_v46 }
 0x378   : > { %v4041_v49 = vpop.f32.mrf.mxu0 }
 0x379   : > { %v3204_v50 = vmax.f32 %v3201_v48, 0.0 }
 0x37b   : > { %4051 = vmatmul.mubr.msk.f32.vlgmr.msra.gmra.mxu1 %vm3210_vm2, %v3204_v50 }
 0x43b   : > { %v3280_v16 = vpop.f32.mrf.mxu1 }
 0x43c   : > { %v3281_v52 = vadd.f32 %v3280_v16, %v3209_v51 }
 0x43d   : > { %v4052_v53 = vpop.f32.mrf.mxu1 }
 0x43e   : > { %3284 = vst [vmem:[%s332_s24] sm:$0x1] %v3281_v52 }
 0x43f PF: > { %s18_s29 = sadd.s32 1, %s4335_s29   ;;  %s5334_s27 = smov %s4331_s28 }
 0x440   : > { %p15_p5 = scmp.ge.s32.totalorder %s18_s29, 4   ;;  %s5335_s28 = smov %s5337_s30 }
 0x442   :  { %17 = sbr.rel (!%p15_p5) target bundleno = 2 (0x2), region = 90 }

</bundles_post_ra>
